<compile_context>
chip_gen: v7x
topology: tpu7x:2x2x1
jax: 0.10.0
libtpu: 0.0.40
codegen_flags: <defaults>
</compile_context>

<pallas_src>
import functools
import math

import jax
import jax.numpy as jnp
from jax.experimental import pallas as pl
from jax.experimental.pallas import tpu as pltpu


# ---------------------------------------------------------------------------
# Helpers
# ---------------------------------------------------------------------------
def _round_up(x, m):
    return (x + m - 1) // m * m


def _pick_time_chunk(seq_len, requested):
    c = max(1, min(requested, seq_len))
    while seq_len % c != 0:
        c -= 1
    return c


# ---------------------------------------------------------------------------
# Fused kernel (all layers + fc), grid = (num_time_chunks,)
# ---------------------------------------------------------------------------
def _make_fused_kernel(num_layers, t_chunk, bp, hp, compute_dtype):
    def kernel(*refs):
        x_ref = refs[0]
        idx = 1
        layer_refs = []
        for _ in range(num_layers):
            layer_refs.append(refs[idx:idx + 4])   # (w_ih_t, b_i, w_hh_t, b_hn)
            idx += 4
        wfc_ref = refs[idx]
        bfc_ref = refs[idx + 1]
        o_ref = refs[idx + 2]
        h_scr = refs[idx + 3]       # (L, Bp, Hp)  persistent recurrent state
        io_scr = refs[idx + 4]      # (T_CHUNK*Bp, Hp) inter-layer chunk buffer

        c = pl.program_id(0)

        @pl.when(c == 0)
        def _():
            h_scr[...] = jnp.zeros_like(h_scr)

        # Layer-0 chunk input: (T_CHUNK*Bp, Din), streamed from HBM.
        inp = x_ref[...]
        final_h = None

        for l, (wih_ref, bi_ref, whh_ref, bhn_ref) in enumerate(layer_refs):
            is_last = (l == num_layers - 1)

            # Chunk-batched input projection: one MXU matmul covering T_CHUNK
            # timesteps, with [b_ir+b_hr, b_iz+b_hz, b_in] pre-folded into b_i.
            gi = (
                jnp.dot(inp.astype(compute_dtype), wih_ref[...],
                        preferred_element_type=jnp.float32)
                + bi_ref[...]
            )                                           # (T_CHUNK*Bp, 3Hp)

            bhn = bhn_ref[...]                          # (1, Hp)
            h = h_scr[l]                                # (Bp, Hp)

            # Serial recurrence over the chunk: one (Bp,Hp)x(Hp,3Hp) matmul/step.
            for t in range(t_chunk):
                gi_t = gi[t * bp:(t + 1) * bp, :]       # sublane-aligned slice
                gh = jnp.dot(h.astype(compute_dtype), whh_ref[...],
                             preferred_element_type=jnp.float32)
                r = jax.nn.sigmoid(gi_t[:, :hp] + gh[:, :hp])
                z = jax.nn.sigmoid(gi_t[:, hp:2 * hp] + gh[:, hp:2 * hp])
                n = jnp.tanh(gi_t[:, 2 * hp:] + r * (gh[:, 2 * hp:] + bhn))
                h = (1.0 - z) * n + z * h
                if not is_last:
                    io_scr[t * bp:(t + 1) * bp, :] = h  # next layer's chunk input

            h_scr[l] = h
            final_h = h
            if not is_last:
                inp = io_scr[...]

        # Final Linear only once, on the very last timestep's hidden state.
        @pl.when(c == pl.num_programs(0) - 1)
        def _():
            o_ref[...] = (
                jnp.dot(final_h.astype(compute_dtype), wfc_ref[...],
                        preferred_element_type=jnp.float32)
                + bfc_ref[...]
            )

    return kernel


def _fused_gru_fc(x2d, params, *, seq_len, bp, time_chunk):
    layers = params["layers"]
    num_layers = len(layers)
    din0 = x2d.shape[1]
    hp = layers[0]["w_hh_t"].shape[0]
    op = params["fc_b"].shape[1]
    cb = time_chunk * bp
    compute_dtype = layers[0]["w_hh_t"].dtype
    num_chunks = seq_len // time_chunk

    in_specs = [pl.BlockSpec((cb, din0), lambda c: (c, 0))]
    args = [x2d]
    for l in range(num_layers):
        lay = layers[l]
        din_l = lay["w_ih_t"].shape[0]
        # Weights/biases are grid-invariant (constant index maps) and stay
        # resident in VMEM.
        # TODO(synk): for production-sized H on v7x (64 MiB VMEM) single-buffer
        # the resident weights (pipeline_mode=pl.Buffered(1)) and set
        # vmem_limit_bytes explicitly.
        in_specs += [
            pl.BlockSpec((din_l, 3 * hp), lambda c: (0, 0)),
            pl.BlockSpec((1, 3 * hp), lambda c: (0, 0)),
            pl.BlockSpec((hp, 3 * hp), lambda c: (0, 0)),
            pl.BlockSpec((1, hp), lambda c: (0, 0)),
        ]
        args += [lay["w_ih_t"], lay["b_i"], lay["w_hh_t"], lay["b_hn"]]
    in_specs += [
        pl.BlockSpec((hp, op), lambda c: (0, 0)),
        pl.BlockSpec((1, op), lambda c: (0, 0)),
    ]
    args += [params["fc_w_t"], params["fc_b"]]

    kernel = _make_fused_kernel(num_layers, time_chunk, bp, hp, compute_dtype)

    # TODO(synk): on v7x, add a leading "parallel" batch grid axis (split Bp
    # across the 2 TensorCores) once B is large enough to tile.
    return pl.pallas_call(
        kernel,
        out_shape=jax.ShapeDtypeStruct((bp, op), jnp.float32),
        grid_spec=pltpu.PrefetchScalarGridSpec(
            num_scalar_prefetch=0,
            grid=(num_chunks,),
            in_specs=in_specs,
            out_specs=pl.BlockSpec((bp, op), lambda c: (0, 0)),
            scratch_shapes=[
                pltpu.VMEM((num_layers, bp, hp), jnp.float32),  # recurrent h
                pltpu.VMEM((cb, hp), jnp.float32),              # inter-layer chunk
            ],
        ),
        compiler_params=pltpu.CompilerParams(
            dimension_semantics=("arbitrary",),  # recurrence: must be sequential
        ),
    )(*args)


# ---------------------------------------------------------------------------
# Forward wrapper (matches GRU.forward of the PyTorch module)
# ---------------------------------------------------------------------------
@functools.partial(jax.jit, static_argnames=("seq_len", "input_size", "time_chunk"))
def gru_forward(x, params, *, seq_len, input_size, time_chunk=4):
    x = x.reshape(-1, seq_len, input_size)           # x.view(-1, seq_len, input_size)
    batch = x.shape[0]
    bp = _round_up(batch, 8)
    xt = jnp.transpose(x, (1, 0, 2)).astype(jnp.float32)   # time-major (T, B, D)
    if bp != batch:
        xt = jnp.pad(xt, ((0, 0), (0, bp - batch), (0, 0)))
    x2d = xt.reshape(seq_len * bp, input_size)        # (T*Bp, Din) for chunk matmuls
    tc = _pick_time_chunk(seq_len, time_chunk)
    out_p = _fused_gru_fc(x2d, params, seq_len=seq_len, bp=bp, time_chunk=tc)
    return out_p[:batch, :input_size]


# ---------------------------------------------------------------------------
# Parameter init (PyTorch layout) and packing/padding for the kernel
# ---------------------------------------------------------------------------
def init_params(key, input_size, hidden_size, num_layers):
    """Raw PyTorch-layout params: uniform(-1/sqrt(H), 1/sqrt(H))."""
    bound = 1.0 / math.sqrt(hidden_size)
    layers = []
    for l in range(num_layers):
        din = input_size if l == 0 else hidden_size
        key, k1, k2, k3, k4 = jax.random.split(key, 5)
        layers.append(dict(
            w_ih=jax.random.uniform(k1, (3 * hidden_size, din), jnp.float32, -bound, bound),
            w_hh=jax.random.uniform(k2, (3 * hidden_size, hidden_size), jnp.float32, -bound, bound),
            b_ih=jax.random.uniform(k3, (3 * hidden_size,), jnp.float32, -bound, bound),
            b_hh=jax.random.uniform(k4, (3 * hidden_size,), jnp.float32, -bound, bound),
        ))
    key, kw, kb = jax.random.split(key, 3)
    fc_w = jax.random.uniform(kw, (input_size, hidden_size), jnp.float32, -bound, bound)
    fc_b = jax.random.uniform(kb, (input_size,), jnp.float32, -bound, bound)
    return dict(layers=layers, fc_w=fc_w, fc_b=fc_b)


def prepare_params(raw, input_size, hidden_size, num_layers, *, compute_dtype=jnp.float32):
    """Pad H/output to 128 (lane-dense gates), fold biases, pre-transpose.

    compute_dtype=jnp.bfloat16 casts matmul operands for MXU peak on
    v5e/v6e/v7x; gate math and accumulation stay f32.
    """
    h = hidden_size
    hp = _round_up(h, 128)
    op = _round_up(input_size, 128)
    layers = []
    for l, lay in enumerate(raw["layers"]):
        din = input_size if l == 0 else hidden_size
        w_ih = lay["w_ih"].reshape(3, h, din)
        if l == 0:
            wih_p = jnp.zeros((3, hp, din), jnp.float32).at[:, :h, :].set(w_ih)
            w_ih_t = jnp.transpose(wih_p, (2, 0, 1)).reshape(din, 3 * hp)
        else:
            wih_p = jnp.zeros((3, hp, hp), jnp.float32).at[:, :h, :h].set(w_ih)
            w_ih_t = jnp.transpose(wih_p, (2, 0, 1)).reshape(hp, 3 * hp)

        w_hh = lay["w_hh"].reshape(3, h, h)
        whh_p = jnp.zeros((3, hp, hp), jnp.float32).at[:, :h, :h].set(w_hh)
        w_hh_t = jnp.transpose(whh_p, (2, 0, 1)).reshape(hp, 3 * hp)

        bi = lay["b_ih"].reshape(3, h)
        bh = lay["b_hh"].reshape(3, h)
        comb = jnp.stack([bi[0] + bh[0], bi[1] + bh[1], bi[2]], axis=0)   # (3, H)
        b_i = jnp.zeros((3, hp), jnp.float32).at[:, :h].set(comb).reshape(1, 3 * hp)
        b_hn = jnp.zeros((1, hp), jnp.float32).at[0, :h].set(bh[2])

        layers.append(dict(
            w_ih_t=w_ih_t.astype(compute_dtype),
            w_hh_t=w_hh_t.astype(compute_dtype),
            b_i=b_i,        # kept f32: added after f32-accumulated matmul
            b_hn=b_hn,
        ))
    fc_w_t = jnp.zeros((hp, op), jnp.float32).at[:h, :input_size].set(raw["fc_w"].T)
    fc_b = jnp.zeros((1, op), jnp.float32).at[0, :input_size].set(raw["fc_b"])
    return dict(layers=layers,
                fc_w_t=fc_w_t.astype(compute_dtype),
                fc_b=fc_b)


# ---------------------------------------------------------------------------
# Pure-JAX reference (PyTorch semantics) for the sanity check
# ---------------------------------------------------------------------------
def gru_forward_ref(x, raw, *, seq_len, input_size):
    x = x.reshape(-1, seq_len, input_size)
    batch = x.shape[0]
    h_seq = jnp.transpose(x, (1, 0, 2))
    for lay in raw["layers"]:
        H = lay["w_hh"].shape[1]
        h = jnp.zeros((batch, H), jnp.float32)
        outs = []
        wih_t, whh_t = lay["w_ih"].T, lay["w_hh"].T
        for t in range(seq_len):
            gi = h_seq[t] @ wih_t + lay["b_ih"]
            gh = h @ whh_t + lay["b_hh"]
            r = jax.nn.sigmoid(gi[:, :H] + gh[:, :H])
            z = jax.nn.sigmoid(gi[:, H:2 * H] + gh[:, H:2 * H])
            n = jnp.tanh(gi[:, 2 * H:] + r * gh[:, 2 * H:])
            h = (1.0 - z) * n + z * h
            outs.append(h)
        h_seq = jnp.stack(outs, axis=0)
    return h_seq[-1] @ raw["fc_w"].T + raw["fc_b"]


# ---------------------------------------------------------------------------
if __name__ == "__main__":
    INPUT_SIZE = 16
    HIDDEN_SIZE = 32
    NUM_LAYERS = 2
    SEQ_LEN = 8
    BATCH = 2

    key = jax.random.PRNGKey(0)
    key, pkey, xkey = jax.random.split(key, 3)
    raw = init_params(pkey, INPUT_SIZE, HIDDEN_SIZE, NUM_LAYERS)
    params = prepare_params(raw, INPUT_SIZE, HIDDEN_SIZE, NUM_LAYERS,
                            compute_dtype=jnp.float32)
    x = jax.random.normal(xkey, (BATCH, SEQ_LEN, INPUT_SIZE), jnp.float32)

    out = gru_forward(x, params, seq_len=SEQ_LEN, input_size=INPUT_SIZE)
    out = jax.block_until_ready(out)

    ref = gru_forward_ref(x, raw, seq_len=SEQ_LEN, input_size=INPUT_SIZE)
    assert out.shape == (BATCH, INPUT_SIZE), out.shape
    assert jnp.allclose(out, ref, atol=1e-4, rtol=1e-4), "mismatch vs reference"

    print("KERNEL_OK")
</pallas_src>

<mosaic_0001>
module attributes {stable_mosaic.version = 11 : i64} {
  func.func @kernel(%arg0: i32, %arg1: memref<32x16xf32, #tpu.memory_space<vmem>>, %arg2: memref<16x384xf32, #tpu.memory_space<vmem>>, %arg3: memref<1x384xf32, #tpu.memory_space<vmem>>, %arg4: memref<128x384xf32, #tpu.memory_space<vmem>>, %arg5: memref<1x128xf32, #tpu.memory_space<vmem>>, %arg6: memref<128x384xf32, #tpu.memory_space<vmem>>, %arg7: memref<1x384xf32, #tpu.memory_space<vmem>>, %arg8: memref<128x384xf32, #tpu.memory_space<vmem>>, %arg9: memref<1x128xf32, #tpu.memory_space<vmem>>, %arg10: memref<128x128xf32, #tpu.memory_space<vmem>>, %arg11: memref<1x128xf32, #tpu.memory_space<vmem>>, %arg12: memref<8x128xf32, #tpu.memory_space<vmem>>, %arg13: memref<2x8x128xf32, #tpu.memory_space<vmem>>, %arg14: memref<32x128xf32, #tpu.memory_space<vmem>>) attributes {dimension_semantics = [#tpu.dimension_semantics<arbitrary>], iteration_bounds = array<i64: 2>, scalar_prefetch = 0 : i64, scratch_operands = 2 : i64, tpu.core_type = #tpu.core_type<tc>, window_params = [{transform_indices = @transform_0, window_bounds = array<i64: 32, 16>}, {pipeline_mode = #tpu.pipeline_mode<synchronous>, transform_indices = @transform_1, window_bounds = array<i64: 16, 384>}, {pipeline_mode = #tpu.pipeline_mode<synchronous>, transform_indices = @transform_2, window_bounds = array<i64: 1, 384>}, {pipeline_mode = #tpu.pipeline_mode<synchronous>, transform_indices = @transform_3, window_bounds = array<i64: 128, 384>}, {pipeline_mode = #tpu.pipeline_mode<synchronous>, transform_indices = @transform_4, window_bounds = array<i64: 1, 128>}, {pipeline_mode = #tpu.pipeline_mode<synchronous>, transform_indices = @transform_5, window_bounds = array<i64: 128, 384>}, {pipeline_mode = #tpu.pipeline_mode<synchronous>, transform_indices = @transform_6, window_bounds = array<i64: 1, 384>}, {pipeline_mode = #tpu.pipeline_mode<synchronous>, transform_indices = @transform_7, window_bounds = array<i64: 128, 384>}, {pipeline_mode = #tpu.pipeline_mode<synchronous>, transform_indices = @transform_8, window_bounds = array<i64: 1, 128>}, {pipeline_mode = #tpu.pipeline_mode<synchronous>, transform_indices = @transform_9, window_bounds = array<i64: 128, 128>}, {pipeline_mode = #tpu.pipeline_mode<synchronous>, transform_indices = @transform_10, window_bounds = array<i64: 1, 128>}, {pipeline_mode = #tpu.pipeline_mode<synchronous>, transform_indices = @transform_11, window_bounds = array<i64: 8, 128>}]} {
    %c0_i32 = arith.constant 0 : i32
    %0 = arith.cmpi eq, %arg0, %c0_i32 : i32
    %1 = arith.extui %0 : i1 to i32
    %c0_i32_0 = arith.constant 0 : i32
    %2 = arith.cmpi ne, %1, %c0_i32_0 : i32
    scf.if %2 {
      %cst_82 = arith.constant 0.000000e+00 : f32
      %282 = vector.broadcast %cst_82 : f32 to vector<2x8x128xf32>
      %c0_83 = arith.constant 0 : index
      %c0_84 = arith.constant 0 : index
      %c0_85 = arith.constant 0 : index
      %283 = vector.load %arg13[%c0_83, %c0_84, %c0_85] : memref<2x8x128xf32, #tpu.memory_space<vmem>>, vector<2x8x128xf32>
      tpu.vector_store %arg13[%c0_83, %c0_84, %c0_85], %282 {strides = array<i32>} : memref<2x8x128xf32, #tpu.memory_space<vmem>>, vector<2x8x128xf32>,
    } else {
    }
    %c0 = arith.constant 0 : index
    %c0_1 = arith.constant 0 : index
    %3 = vector.load %arg1[%c0, %c0_1] : memref<32x16xf32, #tpu.memory_space<vmem>>, vector<32x16xf32>
    %c0_2 = arith.constant 0 : index
    %c0_3 = arith.constant 0 : index
    %4 = vector.load %arg2[%c0_2, %c0_3] : memref<16x384xf32, #tpu.memory_space<vmem>>, vector<16x384xf32>
    %cst = arith.constant dense<0.000000e+00> : vector<32x384xf32>
    %5 = tpu.matmul %3, %4, %cst {dimension_numbers = #tpu.dot_dimension_numbers<[1], [0], [0], [1], [0, 0, 1, 1], [], []>} : vector<32x16xf32>, vector<16x384xf32>, vector<32x384xf32> -> vector<32x384xf32>
    %c0_4 = arith.constant 0 : index
    %c0_5 = arith.constant 0 : index
    %6 = vector.load %arg3[%c0_4, %c0_5] : memref<1x384xf32, #tpu.memory_space<vmem>>, vector<1x384xf32>
    %7 = vector.broadcast %6 : vector<1x384xf32> to vector<32x384xf32>
    %8 = arith.addf %5, %7 : vector<32x384xf32>
    %c0_6 = arith.constant 0 : index
    %c0_7 = arith.constant 0 : index
    %9 = vector.load %arg5[%c0_6, %c0_7] : memref<1x128xf32, #tpu.memory_space<vmem>>, vector<1x128xf32>
    %c0_8 = arith.constant 0 : index
    %c0_9 = arith.constant 0 : index
    %c0_10 = arith.constant 0 : index
    %10 = vector.load %arg13[%c0_8, %c0_9, %c0_10] : memref<2x8x128xf32, #tpu.memory_space<vmem>>, vector<1x8x128xf32>
    %11 = vector.shape_cast %10 : vector<1x8x128xf32> to vector<8x128xf32>
    %12 = vector.extract_strided_slice %8 {offsets = [0, 0], sizes = [8, 384], strides = [1, 1]} : vector<32x384xf32> to vector<8x384xf32>
    %c0_11 = arith.constant 0 : index
    %c0_12 = arith.constant 0 : index
    %13 = vector.load %arg4[%c0_11, %c0_12] : memref<128x384xf32, #tpu.memory_space<vmem>>, vector<128x384xf32>
    %cst_13 = arith.constant dense<0.000000e+00> : vector<8x384xf32>
    %14 = tpu.matmul %11, %13, %cst_13 {dimension_numbers = #tpu.dot_dimension_numbers<[1], [0], [0], [1], [0, 0, 1, 1], [], []>} : vector<8x128xf32>, vector<128x384xf32>, vector<8x384xf32> -> vector<8x384xf32>
    %15 = vector.extract_strided_slice %12 {offsets = [0, 0], sizes = [8, 128], strides = [1, 1]} : vector<8x384xf32> to vector<8x128xf32>
    %16 = vector.extract_strided_slice %14 {offsets = [0, 0], sizes = [8, 128], strides = [1, 1]} : vector<8x384xf32> to vector<8x128xf32>
    %17 = arith.addf %15, %16 : vector<8x128xf32>
    %18 = arith.negf %17 : vector<8x128xf32>
    %19 = math.exp %18 : vector<8x128xf32>
    %cst_14 = arith.constant 1.000000e+00 : f32
    %20 = vector.broadcast %cst_14 : f32 to vector<8x128xf32>
    %21 = arith.addf %20, %19 : vector<8x128xf32>
    %22 = arith.divf %20, %21 : vector<8x128xf32>
    %23 = vector.extract_strided_slice %12 {offsets = [0, 128], sizes = [8, 128], strides = [1, 1]} : vector<8x384xf32> to vector<8x128xf32>
    %24 = vector.extract_strided_slice %14 {offsets = [0, 128], sizes = [8, 128], strides = [1, 1]} : vector<8x384xf32> to vector<8x128xf32>
    %25 = arith.addf %23, %24 : vector<8x128xf32>
    %26 = arith.negf %25 : vector<8x128xf32>
    %27 = math.exp %26 : vector<8x128xf32>
    %cst_15 = arith.constant 1.000000e+00 : f32
    %28 = vector.broadcast %cst_15 : f32 to vector<8x128xf32>
    %29 = arith.addf %28, %27 : vector<8x128xf32>
    %30 = arith.divf %28, %29 : vector<8x128xf32>
    %31 = vector.extract_strided_slice %12 {offsets = [0, 256], sizes = [8, 128], strides = [1, 1]} : vector<8x384xf32> to vector<8x128xf32>
    %32 = vector.extract_strided_slice %14 {offsets = [0, 256], sizes = [8, 128], strides = [1, 1]} : vector<8x384xf32> to vector<8x128xf32>
    %33 = vector.broadcast %9 : vector<1x128xf32> to vector<8x128xf32>
    %34 = arith.addf %32, %33 : vector<8x128xf32>
    %35 = arith.mulf %22, %34 : vector<8x128xf32>
    %36 = arith.addf %31, %35 : vector<8x128xf32>
    %37 = math.tanh %36 : vector<8x128xf32>
    %cst_16 = arith.constant 1.000000e+00 : f32
    %38 = vector.broadcast %cst_16 : f32 to vector<8x128xf32>
    %39 = arith.subf %38, %30 : vector<8x128xf32>
    %40 = arith.mulf %39, %37 : vector<8x128xf32>
    %41 = arith.mulf %30, %11 : vector<8x128xf32>
    %42 = arith.addf %40, %41 : vector<8x128xf32>
    %c0_17 = arith.constant 0 : index
    %c0_18 = arith.constant 0 : index
    %43 = vector.load %arg14[%c0_17, %c0_18] : memref<32x128xf32, #tpu.memory_space<vmem>>, vector<8x128xf32>
    tpu.vector_store %arg14[%c0_17, %c0_18], %42 {strides = array<i32>} : memref<32x128xf32, #tpu.memory_space<vmem>>, vector<8x128xf32>,
    %44 = vector.extract_strided_slice %8 {offsets = [8, 0], sizes = [8, 384], strides = [1, 1]} : vector<32x384xf32> to vector<8x384xf32>
    %c0_19 = arith.constant 0 : index
    %c0_20 = arith.constant 0 : index
    %45 = vector.load %arg4[%c0_19, %c0_20] : memref<128x384xf32, #tpu.memory_space<vmem>>, vector<128x384xf32>
    %cst_21 = arith.constant dense<0.000000e+00> : vector<8x384xf32>
    %46 = tpu.matmul %42, %45, %cst_21 {dimension_numbers = #tpu.dot_dimension_numbers<[1], [0], [0], [1], [0, 0, 1, 1], [], []>} : vector<8x128xf32>, vector<128x384xf32>, vector<8x384xf32> -> vector<8x384xf32>
    %47 = vector.extract_strided_slice %44 {offsets = [0, 0], sizes = [8, 128], strides = [1, 1]} : vector<8x384xf32> to vector<8x128xf32>
    %48 = vector.extract_strided_slice %46 {offsets = [0, 0], sizes = [8, 128], strides = [1, 1]} : vector<8x384xf32> to vector<8x128xf32>
    %49 = arith.addf %47, %48 : vector<8x128xf32>
    %50 = arith.negf %49 : vector<8x128xf32>
    %51 = math.exp %50 : vector<8x128xf32>
    %cst_22 = arith.constant 1.000000e+00 : f32
    %52 = vector.broadcast %cst_22 : f32 to vector<8x128xf32>
    %53 = arith.addf %52, %51 : vector<8x128xf32>
    %54 = arith.divf %52, %53 : vector<8x128xf32>
    %55 = vector.extract_strided_slice %44 {offsets = [0, 128], sizes = [8, 128], strides = [1, 1]} : vector<8x384xf32> to vector<8x128xf32>
    %56 = vector.extract_strided_slice %46 {offsets = [0, 128], sizes = [8, 128], strides = [1, 1]} : vector<8x384xf32> to vector<8x128xf32>
    %57 = arith.addf %55, %56 : vector<8x128xf32>
    %58 = arith.negf %57 : vector<8x128xf32>
    %59 = math.exp %58 : vector<8x128xf32>
    %cst_23 = arith.constant 1.000000e+00 : f32
    %60 = vector.broadcast %cst_23 : f32 to vector<8x128xf32>
    %61 = arith.addf %60, %59 : vector<8x128xf32>
    %62 = arith.divf %60, %61 : vector<8x128xf32>
    %63 = vector.extract_strided_slice %44 {offsets = [0, 256], sizes = [8, 128], strides = [1, 1]} : vector<8x384xf32> to vector<8x128xf32>
    %64 = vector.extract_strided_slice %46 {offsets = [0, 256], sizes = [8, 128], strides = [1, 1]} : vector<8x384xf32> to vector<8x128xf32>
    %65 = vector.broadcast %9 : vector<1x128xf32> to vector<8x128xf32>
    %66 = arith.addf %64, %65 : vector<8x128xf32>
    %67 = arith.mulf %54, %66 : vector<8x128xf32>
    %68 = arith.addf %63, %67 : vector<8x128xf32>
    %69 = math.tanh %68 : vector<8x128xf32>
    %cst_24 = arith.constant 1.000000e+00 : f32
    %70 = vector.broadcast %cst_24 : f32 to vector<8x128xf32>
    %71 = arith.subf %70, %62 : vector<8x128xf32>
    %72 = arith.mulf %71, %69 : vector<8x128xf32>
    %73 = arith.mulf %62, %42 : vector<8x128xf32>
    %74 = arith.addf %72, %73 : vector<8x128xf32>
    %c8 = arith.constant 8 : index
    %c0_25 = arith.constant 0 : index
    %75 = vector.load %arg14[%c8, %c0_25] : memref<32x128xf32, #tpu.memory_space<vmem>>, vector<8x128xf32>
    tpu.vector_store %arg14[%c8, %c0_25], %74 {strides = array<i32>} : memref<32x128xf32, #tpu.memory_space<vmem>>, vector<8x128xf32>,
    %76 = vector.extract_strided_slice %8 {offsets = [16, 0], sizes = [8, 384], strides = [1, 1]} : vector<32x384xf32> to vector<8x384xf32>
    %c0_26 = arith.constant 0 : index
    %c0_27 = arith.constant 0 : index
    %77 = vector.load %arg4[%c0_26, %c0_27] : memref<128x384xf32, #tpu.memory_space<vmem>>, vector<128x384xf32>
    %cst_28 = arith.constant dense<0.000000e+00> : vector<8x384xf32>
    %78 = tpu.matmul %74, %77, %cst_28 {dimension_numbers = #tpu.dot_dimension_numbers<[1], [0], [0], [1], [0, 0, 1, 1], [], []>} : vector<8x128xf32>, vector<128x384xf32>, vector<8x384xf32> -> vector<8x384xf32>
    %79 = vector.extract_strided_slice %76 {offsets = [0, 0], sizes = [8, 128], strides = [1, 1]} : vector<8x384xf32> to vector<8x128xf32>
    %80 = vector.extract_strided_slice %78 {offsets = [0, 0], sizes = [8, 128], strides = [1, 1]} : vector<8x384xf32> to vector<8x128xf32>
    %81 = arith.addf %79, %80 : vector<8x128xf32>
    %82 = arith.negf %81 : vector<8x128xf32>
    %83 = math.exp %82 : vector<8x128xf32>
    %cst_29 = arith.constant 1.000000e+00 : f32
    %84 = vector.broadcast %cst_29 : f32 to vector<8x128xf32>
    %85 = arith.addf %84, %83 : vector<8x128xf32>
    %86 = arith.divf %84, %85 : vector<8x128xf32>
    %87 = vector.extract_strided_slice %76 {offsets = [0, 128], sizes = [8, 128], strides = [1, 1]} : vector<8x384xf32> to vector<8x128xf32>
    %88 = vector.extract_strided_slice %78 {offsets = [0, 128], sizes = [8, 128], strides = [1, 1]} : vector<8x384xf32> to vector<8x128xf32>
    %89 = arith.addf %87, %88 : vector<8x128xf32>
    %90 = arith.negf %89 : vector<8x128xf32>
    %91 = math.exp %90 : vector<8x128xf32>
    %cst_30 = arith.constant 1.000000e+00 : f32
    %92 = vector.broadcast %cst_30 : f32 to vector<8x128xf32>
    %93 = arith.addf %92, %91 : vector<8x128xf32>
    %94 = arith.divf %92, %93 : vector<8x128xf32>
    %95 = vector.extract_strided_slice %76 {offsets = [0, 256], sizes = [8, 128], strides = [1, 1]} : vector<8x384xf32> to vector<8x128xf32>
    %96 = vector.extract_strided_slice %78 {offsets = [0, 256], sizes = [8, 128], strides = [1, 1]} : vector<8x384xf32> to vector<8x128xf32>
    %97 = vector.broadcast %9 : vector<1x128xf32> to vector<8x128xf32>
    %98 = arith.addf %96, %97 : vector<8x128xf32>
    %99 = arith.mulf %86, %98 : vector<8x128xf32>
    %100 = arith.addf %95, %99 : vector<8x128xf32>
    %101 = math.tanh %100 : vector<8x128xf32>
    %cst_31 = arith.constant 1.000000e+00 : f32
    %102 = vector.broadcast %cst_31 : f32 to vector<8x128xf32>
    %103 = arith.subf %102, %94 : vector<8x128xf32>
    %104 = arith.mulf %103, %101 : vector<8x128xf32>
    %105 = arith.mulf %94, %74 : vector<8x128xf32>
    %106 = arith.addf %104, %105 : vector<8x128xf32>
    %c16 = arith.constant 16 : index
    %c0_32 = arith.constant 0 : index
    %107 = vector.load %arg14[%c16, %c0_32] : memref<32x128xf32, #tpu.memory_space<vmem>>, vector<8x128xf32>
    tpu.vector_store %arg14[%c16, %c0_32], %106 {strides = array<i32>} : memref<32x128xf32, #tpu.memory_space<vmem>>, vector<8x128xf32>,
    %108 = vector.extract_strided_slice %8 {offsets = [24, 0], sizes = [8, 384], strides = [1, 1]} : vector<32x384xf32> to vector<8x384xf32>
    %c0_33 = arith.constant 0 : index
    %c0_34 = arith.constant 0 : index
    %109 = vector.load %arg4[%c0_33, %c0_34] : memref<128x384xf32, #tpu.memory_space<vmem>>, vector<128x384xf32>
    %cst_35 = arith.constant dense<0.000000e+00> : vector<8x384xf32>
    %110 = tpu.matmul %106, %109, %cst_35 {dimension_numbers = #tpu.dot_dimension_numbers<[1], [0], [0], [1], [0, 0, 1, 1], [], []>} : vector<8x128xf32>, vector<128x384xf32>, vector<8x384xf32> -> vector<8x384xf32>
    %111 = vector.extract_strided_slice %108 {offsets = [0, 0], sizes = [8, 128], strides = [1, 1]} : vector<8x384xf32> to vector<8x128xf32>
    %112 = vector.extract_strided_slice %110 {offsets = [0, 0], sizes = [8, 128], strides = [1, 1]} : vector<8x384xf32> to vector<8x128xf32>
    %113 = arith.addf %111, %112 : vector<8x128xf32>
    %114 = arith.negf %113 : vector<8x128xf32>
    %115 = math.exp %114 : vector<8x128xf32>
    %cst_36 = arith.constant 1.000000e+00 : f32
    %116 = vector.broadcast %cst_36 : f32 to vector<8x128xf32>
    %117 = arith.addf %116, %115 : vector<8x128xf32>
    %118 = arith.divf %116, %117 : vector<8x128xf32>
    %119 = vector.extract_strided_slice %108 {offsets = [0, 128], sizes = [8, 128], strides = [1, 1]} : vector<8x384xf32> to vector<8x128xf32>
    %120 = vector.extract_strided_slice %110 {offsets = [0, 128], sizes = [8, 128], strides = [1, 1]} : vector<8x384xf32> to vector<8x128xf32>
    %121 = arith.addf %119, %120 : vector<8x128xf32>
    %122 = arith.negf %121 : vector<8x128xf32>
    %123 = math.exp %122 : vector<8x128xf32>
    %cst_37 = arith.constant 1.000000e+00 : f32
    %124 = vector.broadcast %cst_37 : f32 to vector<8x128xf32>
    %125 = arith.addf %124, %123 : vector<8x128xf32>
    %126 = arith.divf %124, %125 : vector<8x128xf32>
    %127 = vector.extract_strided_slice %108 {offsets = [0, 256], sizes = [8, 128], strides = [1, 1]} : vector<8x384xf32> to vector<8x128xf32>
    %128 = vector.extract_strided_slice %110 {offsets = [0, 256], sizes = [8, 128], strides = [1, 1]} : vector<8x384xf32> to vector<8x128xf32>
    %129 = vector.broadcast %9 : vector<1x128xf32> to vector<8x128xf32>
    %130 = arith.addf %128, %129 : vector<8x128xf32>
    %131 = arith.mulf %118, %130 : vector<8x128xf32>
    %132 = arith.addf %127, %131 : vector<8x128xf32>
    %133 = math.tanh %132 : vector<8x128xf32>
    %cst_38 = arith.constant 1.000000e+00 : f32
    %134 = vector.broadcast %cst_38 : f32 to vector<8x128xf32>
    %135 = arith.subf %134, %126 : vector<8x128xf32>
    %136 = arith.mulf %135, %133 : vector<8x128xf32>
    %137 = arith.mulf %126, %106 : vector<8x128xf32>
    %138 = arith.addf %136, %137 : vector<8x128xf32>
    %c24 = arith.constant 24 : index
    %c0_39 = arith.constant 0 : index
    %139 = vector.load %arg14[%c24, %c0_39] : memref<32x128xf32, #tpu.memory_space<vmem>>, vector<8x128xf32>
    tpu.vector_store %arg14[%c24, %c0_39], %138 {strides = array<i32>} : memref<32x128xf32, #tpu.memory_space<vmem>>, vector<8x128xf32>,
    %c0_40 = arith.constant 0 : index
    %c0_41 = arith.constant 0 : index
    %c0_42 = arith.constant 0 : index
    %140 = vector.load %arg13[%c0_40, %c0_41, %c0_42] : memref<2x8x128xf32, #tpu.memory_space<vmem>>, vector<1x8x128xf32>
    %141 = vector.shape_cast %140 : vector<1x8x128xf32> to vector<8x128xf32>
    %142 = vector.shape_cast %138 : vector<8x128xf32> to vector<1x8x128xf32>
    tpu.vector_store %arg13[%c0_40, %c0_41, %c0_42], %142 {strides = array<i32>} : memref<2x8x128xf32, #tpu.memory_space<vmem>>, vector<1x8x128xf32>,
    %c0_43 = arith.constant 0 : index
    %c0_44 = arith.constant 0 : index
    %143 = vector.load %arg14[%c0_43, %c0_44] : memref<32x128xf32, #tpu.memory_space<vmem>>, vector<32x128xf32>
    %c0_45 = arith.constant 0 : index
    %c0_46 = arith.constant 0 : index
    %144 = vector.load %arg6[%c0_45, %c0_46] : memref<128x384xf32, #tpu.memory_space<vmem>>, vector<128x384xf32>
    %cst_47 = arith.constant dense<0.000000e+00> : vector<32x384xf32>
    %145 = tpu.matmul %143, %144, %cst_47 {dimension_numbers = #tpu.dot_dimension_numbers<[1], [0], [0], [1], [0, 0, 1, 1], [], []>} : vector<32x128xf32>, vector<128x384xf32>, vector<32x384xf32> -> vector<32x384xf32>
    %c0_48 = arith.constant 0 : index
    %c0_49 = arith.constant 0 : index
    %146 = vector.load %arg7[%c0_48, %c0_49] : memref<1x384xf32, #tpu.memory_space<vmem>>, vector<1x384xf32>
    %147 = vector.broadcast %146 : vector<1x384xf32> to vector<32x384xf32>
    %148 = arith.addf %145, %147 : vector<32x384xf32>
    %c0_50 = arith.constant 0 : index
    %c0_51 = arith.constant 0 : index
    %149 = vector.load %arg9[%c0_50, %c0_51] : memref<1x128xf32, #tpu.memory_space<vmem>>, vector<1x128xf32>
    %c1 = arith.constant 1 : index
    %c0_52 = arith.constant 0 : index
    %c0_53 = arith.constant 0 : index
    %150 = vector.load %arg13[%c1, %c0_52, %c0_53] : memref<2x8x128xf32, #tpu.memory_space<vmem>>, vector<1x8x128xf32>
    %151 = vector.shape_cast %150 : vector<1x8x128xf32> to vector<8x128xf32>
    %152 = vector.extract_strided_slice %148 {offsets = [0, 0], sizes = [8, 384], strides = [1, 1]} : vector<32x384xf32> to vector<8x384xf32>
    %c0_54 = arith.constant 0 : index
    %c0_55 = arith.constant 0 : index
    %153 = vector.load %arg8[%c0_54, %c0_55] : memref<128x384xf32, #tpu.memory_space<vmem>>, vector<128x384xf32>
    %cst_56 = arith.constant dense<0.000000e+00> : vector<8x384xf32>
    %154 = tpu.matmul %151, %153, %cst_56 {dimension_numbers = #tpu.dot_dimension_numbers<[1], [0], [0], [1], [0, 0, 1, 1], [], []>} : vector<8x128xf32>, vector<128x384xf32>, vector<8x384xf32> -> vector<8x384xf32>
    %155 = vector.extract_strided_slice %152 {offsets = [0, 0], sizes = [8, 128], strides = [1, 1]} : vector<8x384xf32> to vector<8x128xf32>
    %156 = vector.extract_strided_slice %154 {offsets = [0, 0], sizes = [8, 128], strides = [1, 1]} : vector<8x384xf32> to vector<8x128xf32>
    %157 = arith.addf %155, %156 : vector<8x128xf32>
    %158 = arith.negf %157 : vector<8x128xf32>
    %159 = math.exp %158 : vector<8x128xf32>
    %cst_57 = arith.constant 1.000000e+00 : f32
    %160 = vector.broadcast %cst_57 : f32 to vector<8x128xf32>
    %161 = arith.addf %160, %159 : vector<8x128xf32>
    %162 = arith.divf %160, %161 : vector<8x128xf32>
    %163 = vector.extract_strided_slice %152 {offsets = [0, 128], sizes = [8, 128], strides = [1, 1]} : vector<8x384xf32> to vector<8x128xf32>
    %164 = vector.extract_strided_slice %154 {offsets = [0, 128], sizes = [8, 128], strides = [1, 1]} : vector<8x384xf32> to vector<8x128xf32>
    %165 = arith.addf %163, %164 : vector<8x128xf32>
    %166 = arith.negf %165 : vector<8x128xf32>
    %167 = math.exp %166 : vector<8x128xf32>
    %cst_58 = arith.constant 1.000000e+00 : f32
    %168 = vector.broadcast %cst_58 : f32 to vector<8x128xf32>
    %169 = arith.addf %168, %167 : vector<8x128xf32>
    %170 = arith.divf %168, %169 : vector<8x128xf32>
    %171 = vector.extract_strided_slice %152 {offsets = [0, 256], sizes = [8, 128], strides = [1, 1]} : vector<8x384xf32> to vector<8x128xf32>
    %172 = vector.extract_strided_slice %154 {offsets = [0, 256], sizes = [8, 128], strides = [1, 1]} : vector<8x384xf32> to vector<8x128xf32>
    %173 = vector.broadcast %149 : vector<1x128xf32> to vector<8x128xf32>
    %174 = arith.addf %172, %173 : vector<8x128xf32>
    %175 = arith.mulf %162, %174 : vector<8x128xf32>
    %176 = arith.addf %171, %175 : vector<8x128xf32>
    %177 = math.tanh %176 : vector<8x128xf32>
    %cst_59 = arith.constant 1.000000e+00 : f32
    %178 = vector.broadcast %cst_59 : f32 to vector<8x128xf32>
    %179 = arith.subf %178, %170 : vector<8x128xf32>
    %180 = arith.mulf %179, %177 : vector<8x128xf32>
    %181 = arith.mulf %170, %151 : vector<8x128xf32>
    %182 = arith.addf %180, %181 : vector<8x128xf32>
    %183 = vector.extract_strided_slice %148 {offsets = [8, 0], sizes = [8, 384], strides = [1, 1]} : vector<32x384xf32> to vector<8x384xf32>
    %c0_60 = arith.constant 0 : index
    %c0_61 = arith.constant 0 : index
    %184 = vector.load %arg8[%c0_60, %c0_61] : memref<128x384xf32, #tpu.memory_space<vmem>>, vector<128x384xf32>
    %cst_62 = arith.constant dense<0.000000e+00> : vector<8x384xf32>
    %185 = tpu.matmul %182, %184, %cst_62 {dimension_numbers = #tpu.dot_dimension_numbers<[1], [0], [0], [1], [0, 0, 1, 1], [], []>} : vector<8x128xf32>, vector<128x384xf32>, vector<8x384xf32> -> vector<8x384xf32>
    %186 = vector.extract_strided_slice %183 {offsets = [0, 0], sizes = [8, 128], strides = [1, 1]} : vector<8x384xf32> to vector<8x128xf32>
    %187 = vector.extract_strided_slice %185 {offsets = [0, 0], sizes = [8, 128], strides = [1, 1]} : vector<8x384xf32> to vector<8x128xf32>
    %188 = arith.addf %186, %187 : vector<8x128xf32>
    %189 = arith.negf %188 : vector<8x128xf32>
    %190 = math.exp %189 : vector<8x128xf32>
    %cst_63 = arith.constant 1.000000e+00 : f32
    %191 = vector.broadcast %cst_63 : f32 to vector<8x128xf32>
    %192 = arith.addf %191, %190 : vector<8x128xf32>
    %193 = arith.divf %191, %192 : vector<8x128xf32>
    %194 = vector.extract_strided_slice %183 {offsets = [0, 128], sizes = [8, 128], strides = [1, 1]} : vector<8x384xf32> to vector<8x128xf32>
    %195 = vector.extract_strided_slice %185 {offsets = [0, 128], sizes = [8, 128], strides = [1, 1]} : vector<8x384xf32> to vector<8x128xf32>
    %196 = arith.addf %194, %195 : vector<8x128xf32>
    %197 = arith.negf %196 : vector<8x128xf32>
    %198 = math.exp %197 : vector<8x128xf32>
    %cst_64 = arith.constant 1.000000e+00 : f32
    %199 = vector.broadcast %cst_64 : f32 to vector<8x128xf32>
    %200 = arith.addf %199, %198 : vector<8x128xf32>
    %201 = arith.divf %199, %200 : vector<8x128xf32>
    %202 = vector.extract_strided_slice %183 {offsets = [0, 256], sizes = [8, 128], strides = [1, 1]} : vector<8x384xf32> to vector<8x128xf32>
    %203 = vector.extract_strided_slice %185 {offsets = [0, 256], sizes = [8, 128], strides = [1, 1]} : vector<8x384xf32> to vector<8x128xf32>
    %204 = vector.broadcast %149 : vector<1x128xf32> to vector<8x128xf32>
    %205 = arith.addf %203, %204 : vector<8x128xf32>
    %206 = arith.mulf %193, %205 : vector<8x128xf32>
    %207 = arith.addf %202, %206 : vector<8x128xf32>
    %208 = math.tanh %207 : vector<8x128xf32>
    %cst_65 = arith.constant 1.000000e+00 : f32
    %209 = vector.broadcast %cst_65 : f32 to vector<8x128xf32>
    %210 = arith.subf %209, %201 : vector<8x128xf32>
    %211 = arith.mulf %210, %208 : vector<8x128xf32>
    %212 = arith.mulf %201, %182 : vector<8x128xf32>
    %213 = arith.addf %211, %212 : vector<8x128xf32>
    %214 = vector.extract_strided_slice %148 {offsets = [16, 0], sizes = [8, 384], strides = [1, 1]} : vector<32x384xf32> to vector<8x384xf32>
    %c0_66 = arith.constant 0 : index
    %c0_67 = arith.constant 0 : index
    %215 = vector.load %arg8[%c0_66, %c0_67] : memref<128x384xf32, #tpu.memory_space<vmem>>, vector<128x384xf32>
    %cst_68 = arith.constant dense<0.000000e+00> : vector<8x384xf32>
    %216 = tpu.matmul %213, %215, %cst_68 {dimension_numbers = #tpu.dot_dimension_numbers<[1], [0], [0], [1], [0, 0, 1, 1], [], []>} : vector<8x128xf32>, vector<128x384xf32>, vector<8x384xf32> -> vector<8x384xf32>
    %217 = vector.extract_strided_slice %214 {offsets = [0, 0], sizes = [8, 128], strides = [1, 1]} : vector<8x384xf32> to vector<8x128xf32>
    %218 = vector.extract_strided_slice %216 {offsets = [0, 0], sizes = [8, 128], strides = [1, 1]} : vector<8x384xf32> to vector<8x128xf32>
    %219 = arith.addf %217, %218 : vector<8x128xf32>
    %220 = arith.negf %219 : vector<8x128xf32>
    %221 = math.exp %220 : vector<8x128xf32>
    %cst_69 = arith.constant 1.000000e+00 : f32
    %222 = vector.broadcast %cst_69 : f32 to vector<8x128xf32>
    %223 = arith.addf %222, %221 : vector<8x128xf32>
    %224 = arith.divf %222, %223 : vector<8x128xf32>
    %225 = vector.extract_strided_slice %214 {offsets = [0, 128], sizes = [8, 128], strides = [1, 1]} : vector<8x384xf32> to vector<8x128xf32>
    %226 = vector.extract_strided_slice %216 {offsets = [0, 128], sizes = [8, 128], strides = [1, 1]} : vector<8x384xf32> to vector<8x128xf32>
    %227 = arith.addf %225, %226 : vector<8x128xf32>
    %228 = arith.negf %227 : vector<8x128xf32>
    %229 = math.exp %228 : vector<8x128xf32>
    %cst_70 = arith.constant 1.000000e+00 : f32
    %230 = vector.broadcast %cst_70 : f32 to vector<8x128xf32>
    %231 = arith.addf %230, %229 : vector<8x128xf32>
    %232 = arith.divf %230, %231 : vector<8x128xf32>
    %233 = vector.extract_strided_slice %214 {offsets = [0, 256], sizes = [8, 128], strides = [1, 1]} : vector<8x384xf32> to vector<8x128xf32>
    %234 = vector.extract_strided_slice %216 {offsets = [0, 256], sizes = [8, 128], strides = [1, 1]} : vector<8x384xf32> to vector<8x128xf32>
    %235 = vector.broadcast %149 : vector<1x128xf32> to vector<8x128xf32>
    %236 = arith.addf %234, %235 : vector<8x128xf32>
    %237 = arith.mulf %224, %236 : vector<8x128xf32>
    %238 = arith.addf %233, %237 : vector<8x128xf32>
    %239 = math.tanh %238 : vector<8x128xf32>
    %cst_71 = arith.constant 1.000000e+00 : f32
    %240 = vector.broadcast %cst_71 : f32 to vector<8x128xf32>
    %241 = arith.subf %240, %232 : vector<8x128xf32>
    %242 = arith.mulf %241, %239 : vector<8x128xf32>
    %243 = arith.mulf %232, %213 : vector<8x128xf32>
    %244 = arith.addf %242, %243 : vector<8x128xf32>
    %245 = vector.extract_strided_slice %148 {offsets = [24, 0], sizes = [8, 384], strides = [1, 1]} : vector<32x384xf32> to vector<8x384xf32>
    %c0_72 = arith.constant 0 : index
    %c0_73 = arith.constant 0 : index
    %246 = vector.load %arg8[%c0_72, %c0_73] : memref<128x384xf32, #tpu.memory_space<vmem>>, vector<128x384xf32>
    %cst_74 = arith.constant dense<0.000000e+00> : vector<8x384xf32>
    %247 = tpu.matmul %244, %246, %cst_74 {dimension_numbers = #tpu.dot_dimension_numbers<[1], [0], [0], [1], [0, 0, 1, 1], [], []>} : vector<8x128xf32>, vector<128x384xf32>, vector<8x384xf32> -> vector<8x384xf32>
    %248 = vector.extract_strided_slice %245 {offsets = [0, 0], sizes = [8, 128], strides = [1, 1]} : vector<8x384xf32> to vector<8x128xf32>
    %249 = vector.extract_strided_slice %247 {offsets = [0, 0], sizes = [8, 128], strides = [1, 1]} : vector<8x384xf32> to vector<8x128xf32>
    %250 = arith.addf %248, %249 : vector<8x128xf32>
    %251 = arith.negf %250 : vector<8x128xf32>
    %252 = math.exp %251 : vector<8x128xf32>
    %cst_75 = arith.constant 1.000000e+00 : f32
    %253 = vector.broadcast %cst_75 : f32 to vector<8x128xf32>
    %254 = arith.addf %253, %252 : vector<8x128xf32>
    %255 = arith.divf %253, %254 : vector<8x128xf32>
    %256 = vector.extract_strided_slice %245 {offsets = [0, 128], sizes = [8, 128], strides = [1, 1]} : vector<8x384xf32> to vector<8x128xf32>
    %257 = vector.extract_strided_slice %247 {offsets = [0, 128], sizes = [8, 128], strides = [1, 1]} : vector<8x384xf32> to vector<8x128xf32>
    %258 = arith.addf %256, %257 : vector<8x128xf32>
    %259 = arith.negf %258 : vector<8x128xf32>
    %260 = math.exp %259 : vector<8x128xf32>
    %cst_76 = arith.constant 1.000000e+00 : f32
    %261 = vector.broadcast %cst_76 : f32 to vector<8x128xf32>
    %262 = arith.addf %261, %260 : vector<8x128xf32>
    %263 = arith.divf %261, %262 : vector<8x128xf32>
    %264 = vector.extract_strided_slice %245 {offsets = [0, 256], sizes = [8, 128], strides = [1, 1]} : vector<8x384xf32> to vector<8x128xf32>
    %265 = vector.extract_strided_slice %247 {offsets = [0, 256], sizes = [8, 128], strides = [1, 1]} : vector<8x384xf32> to vector<8x128xf32>
    %266 = vector.broadcast %149 : vector<1x128xf32> to vector<8x128xf32>
    %267 = arith.addf %265, %266 : vector<8x128xf32>
    %268 = arith.mulf %255, %267 : vector<8x128xf32>
    %269 = arith.addf %264, %268 : vector<8x128xf32>
    %270 = math.tanh %269 : vector<8x128xf32>
    %cst_77 = arith.constant 1.000000e+00 : f32
    %271 = vector.broadcast %cst_77 : f32 to vector<8x128xf32>
    %272 = arith.subf %271, %263 : vector<8x128xf32>
    %273 = arith.mulf %272, %270 : vector<8x128xf32>
    %274 = arith.mulf %263, %244 : vector<8x128xf32>
    %275 = arith.addf %273, %274 : vector<8x128xf32>
    %c1_78 = arith.constant 1 : index
    %c0_79 = arith.constant 0 : index
    %c0_80 = arith.constant 0 : index
    %276 = vector.load %arg13[%c1_78, %c0_79, %c0_80] : memref<2x8x128xf32, #tpu.memory_space<vmem>>, vector<1x8x128xf32>
    %277 = vector.shape_cast %276 : vector<1x8x128xf32> to vector<8x128xf32>
    %278 = vector.shape_cast %275 : vector<8x128xf32> to vector<1x8x128xf32>
    tpu.vector_store %arg13[%c1_78, %c0_79, %c0_80], %278 {strides = array<i32>} : memref<2x8x128xf32, #tpu.memory_space<vmem>>, vector<1x8x128xf32>,
    %c1_i32 = arith.constant 1 : i32
    %279 = arith.cmpi eq, %arg0, %c1_i32 : i32
    %280 = arith.extui %279 : i1 to i32
    %c0_i32_81 = arith.constant 0 : i32
    %281 = arith.cmpi ne, %280, %c0_i32_81 : i32
    scf.if %281 {
      %c0_82 = arith.constant 0 : index
      %c0_83 = arith.constant 0 : index
      %282 = vector.load %arg10[%c0_82, %c0_83] : memref<128x128xf32, #tpu.memory_space<vmem>>, vector<128x128xf32>
      %cst_84 = arith.constant dense<0.000000e+00> : vector<8x128xf32>
      %283 = tpu.matmul %275, %282, %cst_84 {dimension_numbers = #tpu.dot_dimension_numbers<[1], [0], [0], [1], [0, 0, 1, 1], [], []>} : vector<8x128xf32>, vector<128x128xf32>, vector<8x128xf32> -> vector<8x128xf32>
      %c0_85 = arith.constant 0 : index
      %c0_86 = arith.constant 0 : index
      %284 = vector.load %arg11[%c0_85, %c0_86] : memref<1x128xf32, #tpu.memory_space<vmem>>, vector<1x128xf32>
      %285 = vector.broadcast %284 : vector<1x128xf32> to vector<8x128xf32>
      %286 = arith.addf %283, %285 : vector<8x128xf32>
      %c0_87 = arith.constant 0 : index
      %c0_88 = arith.constant 0 : index
      %287 = vector.load %arg12[%c0_87, %c0_88] : memref<8x128xf32, #tpu.memory_space<vmem>>, vector<8x128xf32>
      tpu.vector_store %arg12[%c0_87, %c0_88], %286 {strides = array<i32>} : memref<8x128xf32, #tpu.memory_space<vmem>>, vector<8x128xf32>,
    } else {
    }
    return
  }
  func.func @transform_0(%arg0: i32) -> (i32, i32) {
    %c0_i32 = arith.constant 0 : i32
    %c0_i32_0 = arith.constant 0 : i32
    return %arg0, %c0_i32 : i32, i32
  }
  func.func @transform_1(%arg0: i32) -> (i32, i32) {
    %c0_i32 = arith.constant 0 : i32
    %c0_i32_0 = arith.constant 0 : i32
    %c0_i32_1 = arith.constant 0 : i32
    return %c0_i32, %c0_i32_0 : i32, i32
  }
  func.func @transform_2(%arg0: i32) -> (i32, i32) {
    %c0_i32 = arith.constant 0 : i32
    %c0_i32_0 = arith.constant 0 : i32
    %c0_i32_1 = arith.constant 0 : i32
    return %c0_i32, %c0_i32_0 : i32, i32
  }
  func.func @transform_3(%arg0: i32) -> (i32, i32) {
    %c0_i32 = arith.constant 0 : i32
    %c0_i32_0 = arith.constant 0 : i32
    %c0_i32_1 = arith.constant 0 : i32
    return %c0_i32, %c0_i32_0 : i32, i32
  }
  func.func @transform_4(%arg0: i32) -> (i32, i32) {
    %c0_i32 = arith.constant 0 : i32
    %c0_i32_0 = arith.constant 0 : i32
    %c0_i32_1 = arith.constant 0 : i32
    return %c0_i32, %c0_i32_0 : i32, i32
  }
  func.func @transform_5(%arg0: i32) -> (i32, i32) {
    %c0_i32 = arith.constant 0 : i32
    %c0_i32_0 = arith.constant 0 : i32
    %c0_i32_1 = arith.constant 0 : i32
    return %c0_i32, %c0_i32_0 : i32, i32
  }
  func.func @transform_6(%arg0: i32) -> (i32, i32) {
    %c0_i32 = arith.constant 0 : i32
    %c0_i32_0 = arith.constant 0 : i32
    %c0_i32_1 = arith.constant 0 : i32
    return %c0_i32, %c0_i32_0 : i32, i32
  }
  func.func @transform_7(%arg0: i32) -> (i32, i32) {
    %c0_i32 = arith.constant 0 : i32
    %c0_i32_0 = arith.constant 0 : i32
    %c0_i32_1 = arith.constant 0 : i32
    return %c0_i32, %c0_i32_0 : i32, i32
  }
  func.func @transform_8(%arg0: i32) -> (i32, i32) {
    %c0_i32 = arith.constant 0 : i32
    %c0_i32_0 = arith.constant 0 : i32
    %c0_i32_1 = arith.constant 0 : i32
    return %c0_i32, %c0_i32_0 : i32, i32
  }
  func.func @transform_9(%arg0: i32) -> (i32, i32) {
    %c0_i32 = arith.constant 0 : i32
    %c0_i32_0 = arith.constant 0 : i32
    %c0_i32_1 = arith.constant 0 : i32
    return %c0_i32, %c0_i32_0 : i32, i32
  }
  func.func @transform_10(%arg0: i32) -> (i32, i32) {
    %c0_i32 = arith.constant 0 : i32
    %c0_i32_0 = arith.constant 0 : i32
    %c0_i32_1 = arith.constant 0 : i32
    return %c0_i32, %c0_i32_0 : i32, i32
  }
  func.func @transform_11(%arg0: i32) -> (i32, i32) {
    %c0_i32 = arith.constant 0 : i32
    %c0_i32_0 = arith.constant 0 : i32
    %c0_i32_1 = arith.constant 0 : i32
    return %c0_i32, %c0_i32_0 : i32, i32
  }
}

</mosaic_0001>

<bundles_post_ra>
// kernel: gru_forward.1
= control target key start
LH: loop header
LB: loop body
LE: loop exit
PB: predicated region body
PF: predicated region fallthrough
CT: control target
= control target key end

     0   :  { %16 = vsyncpa [#allocation5], 0  ;;  %s4849_s0 = inlined_call_operand.vmem [shape: f32[64,16], index: 0, kind: input, shape index: {}]   ;;  %s4850_s1 = inlined_call_operand.vmem [shape: f32[16,384], index: 1, kind: input, shape index: {}]   ;;  %s4851_s2 = inlined_call_operand.vmem [shape: f32[1,384], index: 2, kind: input, shape index: {}]   ;;  %s4852_s3 = inlined_call_operand.hbm [shape: f32[128,384], index: 3, kind: input, shape index: {}]   ;;  %s4853_s4 = inlined_call_operand.vmem [shape: f32[1,128], index: 4, kind: input, shape index: {}]   ;;  %s4854_s5 = inlined_call_operand.hbm [shape: f32[128,384], index: 5, kind: input, shape index: {}]   ;;  %s4855_s6 = inlined_call_operand.vmem [shape: f32[1,384], index: 6, kind: input, shape index: {}]   ;;  %s4856_s7 = inlined_call_operand.hbm [shape: f32[128,384], index: 7, kind: input, shape index: {}]   ;;  %s4857_s8 = inlined_call_operand.vmem [shape: f32[1,128], index: 8, kind: input, shape index: {}]   ;;  %s4858_s9 = inlined_call_operand.hbm [shape: f32[128,128], index: 9, kind: input, shape index: {}]   ;;  %s4859_s10 = inlined_call_operand.vmem [shape: f32[1,128], index: 10, kind: input, shape index: {}]   ;;  %s4860_s11 = inlined_call_operand.vmem [shape: f32[8,128], index: 11, kind: output, shape index: {}]  }
   0x1   :  { %17 = vsyncpa [#allocation7], 0 }
   0x2   :  { %18 = vsyncpa [#allocation10], 0  ;;  %s4140_s17 = smov 0  }
   0x3 LB: > { %4864 = sst [smem:[#allocation14_spill]] %s4063_s17  ;;  %s4146_s18 = sadd.s32 4294967295, %s4063_s17   ;;  %s4063_s17 = sphi %s4140_s17, %s24_s17  }
   0x4   : > { %p2631_p0 = scmp.ge.s32.totalorder %s4063_s17, 1  ;;  %p286_p1 = scmp.lt.s32.totalorder %s4063_s17, 3 }
   0x5   : > { %p4862_p3 = scmp.eq.s32.totalorder %s4146_s18, 0  ;;  %s4065_s20 = smov [#allocation6]  }
   0x6   : > { %p4152_p4 = pnand %p2631_p0, %p286_p1  ;;  %s320_s21 = sshll.u32 %s4065_s20, 4  ;;  %s4156_s21 = int_to_ptr.vmem [resolvable:$true] %s320_s21 }
   0x7   : > { %s4066_s22 = smov [#allocation4]   ;;  %s4067_s25 = smov [#allocation8]  }
   0x8   : > { %s4865_s19 = scalar_select %p4152_p4, 1, 0 }
   0x9   : > { %p3809_p5 = pneg %p4152_p4  ;;  %s304_s23 = sshll.u32 %s4066_s22, 4  ;;  %s4160_s23 = int_to_ptr.vmem [resolvable:$true] %s304_s23 }
   0xa   : > { %s336_s26 = sshll.u32 %s4067_s25, 4  ;;  %s4068_s27 = smov [#allocation9]   ;;  %s4168_s26 = int_to_ptr.vmem [resolvable:$true] %s336_s26 }
   0xb   : > { %p4164_p6 = pnand %p4862_p3, %p3809_p5  ;;  %s4170_s28 = sshll.u32 %s4068_s27, 4  ;;  %s353_s28 = int_to_ptr.vmem [resolvable:$true] %s4170_s28 }
   0xc   : > { %s3933_s12 = scalar_lea.hbm %s4854_s5, 6144 }
   0xd   : > { %p3934_p7 = scmp.ne.s32.totalorder %s4854_s5, %s3933_s12  ;;  %p4180_p8 = pneg %p4164_p6 }
   0xe   : > { %p3940_p11 = scmp.lt.u32.totalorder %s3933_s12, %s4854_s5 }
   0xf   : > { %p3936_p9 = pnand %p4180_p8, %p3934_p7 }
  0x11   : > { %p3937_p10 = pneg %p3936_p9 }
  0x13   : > { %p3942_p12 = pnand %p3940_p11, %p3937_p10 }
  0x15   : > { %3945 = shalt.err (!%p3942_p12)
}
  0x16   : > { %s3946_s22 = scalar_lea.vmem %s4156_s21, 6144  ;;  %p3954_p5 = scmp.lt.s32.totalorder %s4156_s21, %s4156_s21 }
  0x17   : > { %p3947_p13 = scmp.ne.s32.totalorder %s4156_s21, %s3946_s22  ;;  %p3955_p2 = scmp.lt.s32.totalorder %s3946_s22, %s3946_s22 }
  0x19   : > { %p3949_p0 = pnand %p3947_p13, %p4180_p8  ;;  %p3956_p7 = por %p3955_p2, %p3954_p5 }
  0x1b   : > { %p3950_p1 = pneg %p3949_p0 }
  0x1d   : > { %p3957_p9 = pnand %p3956_p7, %p3950_p1 }
  0x1f   : > { %3960 = shalt.err (!%p3957_p9)
}
  0x20   : > { %s4069_s25 = smov 384   ;;  %s4070_s27 = smov 24  }
  0x21   : > { %3815 = dma.hbm_to_vmem [thread:$0]  (!%p4164_p6), %s4854_s5, 6144, %s4156_s21, [#allocation7], %s4069_s25, %s4069_s25, %s4070_s27  }
  0x22   : > { %s3961_s14 = scalar_lea.hbm %s4852_s3, 6144 }
  0x23   : > { %p3962_p2 = scmp.ne.s32.totalorder %s4852_s3, %s3961_s14  ;;  %p3968_p12 = scmp.lt.u32.totalorder %s3961_s14, %s4852_s3 }
  0x25   : > { %p3964_p10 = pnand %p3962_p2, %p4180_p8 }
  0x27   : > { %p3965_p11 = pneg %p3964_p10 }
  0x29   : > { %p3970_p13 = pnand %p3968_p12, %p3965_p11 }
  0x2b   : > { %3973 = shalt.err (!%p3970_p13)
}
  0x2c   : > { %s3974_s21 = scalar_lea.vmem %s4160_s23, 6144  ;;  %p3982_p7 = scmp.lt.s32.totalorder %s4160_s23, %s4160_s23 }
  0x2d   : > { %p3975_p0 = scmp.ne.s32.totalorder %s4160_s23, %s3974_s21  ;;  %p3983_p9 = scmp.lt.s32.totalorder %s3974_s21, %s3974_s21 }
  0x2f   : > { %p3977_p1 = pnand %p3975_p0, %p4180_p8  ;;  %p3984_p2 = por %p3983_p9, %p3982_p7 }
  0x31   : > { %p3978_p5 = pneg %p3977_p1 }
  0x33   : > { %p3985_p10 = pnand %p3984_p2, %p3978_p5 }
  0x35   : > { %3988 = shalt.err (!%p3985_p10)
}
  0x36   : > { %3812 = dma.hbm_to_vmem [thread:$0]  (!%p4164_p6), %s4852_s3, 6144, %s4160_s23, [#allocation5], %s4069_s25, %s4069_s25, %s4070_s27  }
  0x37   : > { %s3989_s13 = scalar_lea.hbm %s4856_s7, 6144 }
  0x38   : > { %p3990_p11 = scmp.ne.s32.totalorder %s4856_s7, %s3989_s13  ;;  %p3996_p0 = scmp.lt.u32.totalorder %s3989_s13, %s4856_s7 }
  0x3a   : > { %p3992_p12 = pnand %p3990_p11, %p4180_p8 }
  0x3c   : > { %p3993_p13 = pneg %p3992_p12 }
  0x3e   : > { %p3998_p1 = pnand %p3996_p0, %p3993_p13 }
  0x40   : > { %4001 = shalt.err (!%p3998_p1)
}
  0x41   : > { %s4002_s23 = scalar_lea.vmem %s4168_s26, 6144  ;;  %p4010_p2 = scmp.lt.s32.totalorder %s4168_s26, %s4168_s26 }
  0x42   : > { %p4003_p5 = scmp.ne.s32.totalorder %s4168_s26, %s4002_s23  ;;  %p4011_p10 = scmp.lt.s32.totalorder %s4002_s23, %s4002_s23 }
  0x44   : > { %p4005_p7 = pnand %p4003_p5, %p4180_p8  ;;  %p4012_p11 = por %p4011_p10, %p4010_p2 }
  0x46   : > { %p4006_p9 = pneg %p4005_p7 }
  0x48   : > { %p4013_p12 = pnand %p4012_p11, %p4006_p9 }
  0x4a   : > { %4016 = shalt.err (!%p4013_p12)
}
  0x4b   : > { %3818 = dma.hbm_to_vmem [thread:$0]  (!%p4164_p6), %s4856_s7, 6144, %s4168_s26, [#allocation7], %s4069_s25, %s4069_s25, %s4070_s27  }
  0x4c   : > { %s4017_s12 = scalar_lea.hbm %s4858_s9, 2048 }
  0x4d   : > { %p4018_p13 = scmp.ne.s32.totalorder %s4858_s9, %s4017_s12  ;;  %p4024_p5 = scmp.lt.u32.totalorder %s4017_s12, %s4858_s9 }
  0x4f   : > { %p4020_p0 = pnand %p4018_p13, %p4180_p8 }
  0x51   : > { %p4021_p1 = pneg %p4020_p0 }
  0x53   : > { %p4026_p7 = pnand %p4024_p5, %p4021_p1 }
  0x55   : > { %4029 = shalt.err (!%p4026_p7)
}
  0x56   : > { %s4030_s22 = scalar_lea.vmem %s353_s28, 2048  ;;  %p4038_p11 = scmp.lt.s32.totalorder %s353_s28, %s353_s28 }
  0x57   : > { %p4031_p9 = scmp.ne.s32.totalorder %s353_s28, %s4030_s22  ;;  %p4039_p12 = scmp.lt.s32.totalorder %s4030_s22, %s4030_s22 }
  0x59   : > { %p4033_p2 = pnand %p4031_p9, %p4180_p8  ;;  %p4040_p3 = por %p4039_p12, %p4038_p11 }
  0x5b   : > { %p4034_p10 = pneg %p4033_p2 }
  0x5d   : > { %p4041_p4 = pnand %p4040_p3, %p4034_p10 }
  0x5f   : > { %4044 = shalt.err (!%p4041_p4)
}
  0x60   : > { %s4071_s26 = smov 128   ;;  %s4072_s25 = smov 8  }
  0x61   : > { %3821 = dma.hbm_to_vmem [thread:$0]  (!%p4164_p6), %s4858_s9, 2048, %s353_s28, [#allocation10], %s4071_s26, %s4071_s26, %s4072_s25  }
  0x62   : > { %p4868_p13 = scmp.ne.s32.totalorder %s4865_s19, 0 }
  0x63   : > { %p4869_p0 = scmp.eq.s32.totalorder (!%p4868_p13), %s4146_s18, 0 }
  0x64   : > { %380 = sbr.rel (%p4868_p13) target bundleno = 2453 (0x995), region = 64 }
  0x6b   : > { %4050 = dma.done.wait (%p4869_p0), [#allocation5], 6144   ;;  %p4870_p8 = pmov %p4869_p0 }
  0x6c   : > { %p4871_p3 = pmov %p4869_p0 }
  0x6d   : > { %4052 = vsyncadd (%p4870_p8), [#allocation5], 4294961152 }
  0x6e   : > { %4054 = dma.done.wait (%p4871_p3), [#allocation7], 12288   ;;  %p4872_p4 = pmov %p4869_p0 }
  0x6f   : > { %p4873_p1 = pmov %p4869_p0 }
  0x70   : > { %4056 = vsyncadd (%p4872_p4), [#allocation7], 4294955008 }
  0x71   : > { %4058 = dma.done.wait (%p4873_p1), [#allocation10], 2048   ;;  %p4874_p6 = pmov %p4869_p0 }
  0x72   : > { %s2642_s19 = sshll.u32 %s4146_s18, 2  ;;  %p4875_p7 = scmp.ne.s32.totalorder %s4146_s18, 0 }
  0x73   : > { %4060 = vsyncadd (%p4874_p6), [#allocation10], 4294965248  ;;  %p428_p5 = scmp.lt.s32.totalorder %s2642_s19, 7  ;;  %v4073_v0 = vmov (!%p4875_p7), 0.0  }
  0x74   : > { %436 = sbr.rel (%p4875_p7) target bundleno = 123 (0x7b), region = 84  ;;  %437 = vst [vmem:[#allocation2] sm:$0xff] (!%p4875_p7), %v4073_v0  ;;  %438 = vst [vmem:[#allocation2 + $0x8] sm:$0xff] (!%p4875_p7), %v4073_v0 }
  0x75   : > { %s4878_s19 = smov (!%p428_p5, %s2642_s19), 7 }
  0x76   : > { %s2643_s24 = sshll.u32 %s4878_s19, 3 }
  0x77   : > { %s4293_s21 = scalar_lea.vmem %s4849_s0, %s2643_s24 }
  0x7b PF: > { %v444_v1 = vld [vmem:[%s4850_s1 + $0x8] sm:$0xff]  ;;  %v447_v2 = vld [vmem:[%s4850_s1 + $0x20] sm:$0xff]  ;;  %v446_v5 = vld [vmem:[%s4850_s1 + $0x18] sm:$0xff]  ;;  %v4074_v6 = vmov 0.0   ;;  %vm466_vm0 = vcmask 130048   ;;  %v4075_v42 = vmov 0.0|0.0  }
  0x7c   : > { %v443_v3 = vld [vmem:[%s4850_s1] sm:$0xff]  ;;  %v3217_v4 = vpack.c.bf16 %v447_v2, %v444_v1  ;;  %543 = vmatprep.mubr.f32.mxu0 %v4074_v6  ;;  %v656_v7 = vld [vmem:[#allocation4 + $0x8] sm:$0xff]  ;;  %v659_v8 = vld [vmem:[#allocation4 + $0x20] sm:$0xff]  ;;  %vm4076_vm1 = vmmov 0   ;;  %p2671_p9 = scmp.ne.s32.totalorder %s4146_s18, 1 }
  0x7d   : > { %v3219_v9 = vpack.c.bf16 %v446_v5, %v443_v3  ;;  %v4310_v10 = vpack.c.bf16 %v659_v8, %v656_v7  ;;  %v439_v11 = vld [vmem:[%s4293_s21] sm:$0xff]  ;;  %v655_v12 = vld [vmem:[#allocation4] sm:$0xff]  ;;  %v658_v13 = vld [vmem:[#allocation4 + $0x18] sm:$0xff]  ;;  %vm4078_vm2 = vmmov (!%p2671_p9), 0  }
  0x7e   : > { %3218 = vmatprep.subr.bf16.mxu0 %v3217_v4  ;;  %v662_v14 = vld [vmem:[#allocation4 + $0x38] sm:$0xff]  ;;  %v665_v15 = vld [vmem:[#allocation4 + $0x50] sm:$0xff]  ;;  %2858 = vmatprep.mubr.msk.f32.mxu1 %vm466_vm0, %v439_v11  ;;  %v4314_v16 = vpack.c.bf16 %v658_v13, %v655_v12  ;;  %v664_v19 = vld [vmem:[#allocation4 + $0x48] sm:$0xff] }
  0x7f   : > { %3220 = vmatpush1.bf16.msra.mxu0 %v3219_v9  ;;  %v4317_v17 = vpack.c.bf16 %v665_v15, %v662_v14  ;;  %v661_v18 = vld [vmem:[#allocation4 + $0x30] sm:$0xff]  ;;  %v668_v20 = vld [vmem:[#allocation4 + $0x68] sm:$0xff]  ;;  %v671_v21 = vld [vmem:[#allocation4 + $0x80] sm:$0xff] }
  0x80   : > { %3226 = vmatprep.subr.bf16.mxu0 %v4310_v10  ;;  %v4321_v22 = vpack.c.bf16 %v664_v19, %v661_v18  ;;  %v667_v23 = vld [vmem:[#allocation4 + $0x60] sm:$0xff]  ;;  %v440_v24 = vld [vmem:[%s4293_s21 + $0x8] sm:$0xff]  ;;  %v4326_v25 = vpack.c.bf16 %v671_v21, %v668_v20  ;;  %v677_v30 = vld [vmem:[#allocation4 + $0xb0] sm:$0xff] }
  0x81   : > { %v670_v26 = vld [vmem:[#allocation4 + $0x78] sm:$0xff]  ;;  %v445_v27 = vld [vmem:[%s4850_s1 + $0x10] sm:$0xff]  ;;  %v657_v34 = vld [vmem:[#allocation4 + $0x10] sm:$0xff] }
  0x82   : > { %2645 = vmatmul.mubr.msk.f32.vlgmr.msra.gmra.mrb[0].mxu0 %vm466_vm0, %v439_v11  ;;  %v448_v28 = vld [vmem:[%s4850_s1 + $0x28] sm:$0xff]  ;;  %v4336_v32 = vpack.c.bf16 %v670_v26, %v667_v23  ;;  %v441_v33 = vld [vmem:[%s4293_s21 + $0x10] sm:$0xff]  ;;  %v660_v35 = vld [vmem:[#allocation4 + $0x28] sm:$0xff] }
  0x83   : > { %3228 = vmatpush1.bf16.msra.mxu0 %v4314_v16  ;;  %549 = vmatprep.mubr.f32.mxu0 %v4074_v6  ;;  %v674_v29 = vld [vmem:[#allocation4 + $0x98] sm:$0xff]  ;;  %v3221_v31 = vpack.c.bf16 %v448_v28, %v445_v27  ;;  %v673_v37 = vld [vmem:[#allocation4 + $0x90] sm:$0xff]  ;;  %v676_v38 = vld [vmem:[#allocation4 + $0xa8] sm:$0xff]  ;;  %v4342_v39 = vpack.c.bf16 %v660_v35, %v657_v34 }
  0x84   : > { %3230 = vmatprep.subr.bf16.mxu0 %v4317_v17  ;;  %v4340_v36 = vpack.c.bf16 %v677_v30, %v674_v29  ;;  %v680_v40 = vld [vmem:[#allocation4 + $0xc8] sm:$0xff]  ;;  %v683_v41 = vld [vmem:[#allocation4 + $0xe0] sm:$0xff]  ;;  %v666_v44 = vld [vmem:[#allocation4 + $0x58] sm:$0xff]  ;;  %v4348_v45 = vpack.c.bf16 %v676_v38, %v673_v37 }
  0x85   : > { %3222 = vmatprep.subr.bf16.mxu1 %v3221_v31  ;;  %v663_v43 = vld [vmem:[#allocation4 + $0x40] sm:$0xff]  ;;  %v442_v46 = vld [vmem:[%s4293_s21 + $0x18] sm:$0xff]  ;;  %v4353_v47 = vpack.c.bf16 %v683_v41, %v680_v40  ;;  %v682_v49 = vld [vmem:[#allocation4 + $0xd8] sm:$0xff] }
  0x86   : > { %2646 = vmatmul.mubr.msk.f32.gmra.mrb[2].mxu0 %vm466_vm0, %v440_v24  ;;  %3224 = vmatpush3.bf16.msra.mxu1 %v3221_v31  ;;  %v679_v48 = vld [vmem:[#allocation4 + $0xc0] sm:$0xff]  ;;  %v686_v50 = vld [vmem:[#allocation4 + $0xf8] sm:$0xff]  ;;  %v4356_v51 = vpack.c.bf16 %v666_v44, %v663_v43  ;;  %v689_v52 = vld [vmem:[#allocation4 + $0x110] sm:$0xff]  ;;  %v451_v31 = vlaneseq }
  0x87   : > { %3232 = vmatpush1.bf16.msra.mxu0 %v4321_v22  ;;  %555 = vmatprep.mubr.f32.mxu0 %v4074_v6  ;;  %v669_v53 = vld [vmem:[#allocation4 + $0x70] sm:$0xff]  ;;  %v672_v54 = vld [vmem:[#allocation4 + $0x88] sm:$0xff]  ;;  %v4363_v55 = vpack.c.bf16 %v682_v49, %v679_v48  ;;  %v4367_v56 = vpack.c.bf16 %v689_v52, %v686_v50  ;;  %v695_v61 = vld [vmem:[#allocation4 + $0x140] sm:$0xff] }
  0x88   : > { %3234 = vmatprep.subr.bf16.mxu0 %v4326_v25  ;;  %3257 = vmatprep.subr.bf16.mxu1 %v4075_v42  ;;  %v685_v57 = vld [vmem:[#allocation4 + $0xf0] sm:$0xff]  ;;  %v688_v58 = vld [vmem:[#allocation4 + $0x108] sm:$0xff]  ;;  %v4370_v60 = vpack.c.bf16 %v672_v54, %v669_v53  ;;  %v675_v62 = vld [vmem:[#allocation4 + $0xa0] sm:$0xff] }
  0x89   : > { %2859 = vmatmul.mubr.msk.f32.vlgmr.msra.gmra.mrb[0].mxu1 %vm466_vm0, %v440_v24  ;;  %v692_v59 = vld [vmem:[#allocation4 + $0x128] sm:$0xff]  ;;  %v678_v63 = vld [vmem:[#allocation4 + $0xb8] sm:$0xff]  ;;  %v4377_v0 = vpack.c.bf16 %v688_v58, %v685_v57  ;;  %v691_v2 = vld [vmem:[#allocation4 + $0x120] sm:$0xff] }
  0x8a   : > { %2647 = vmatmul.mubr.msk.f32.gmra.mrb[4].mxu0 %vm466_vm0, %v441_v33  ;;  %3259 = vmatpush3.bf16.msra.mxu1 %v4342_v39  ;;  %v4380_v1 = vpack.c.bf16 %v695_v61, %v692_v59  ;;  %v694_v3 = vld [vmem:[#allocation4 + $0x138] sm:$0xff]  ;;  %v4383_v5 = vpack.c.bf16 %v678_v63, %v675_v62  ;;  %v701_v7 = vld [vmem:[#allocation4 + $0x170] sm:$0xff]  ;;  %v684_v9 = vld [vmem:[#allocation4 + $0xe8] sm:$0xff] }
  0x8b   : > { %3236 = vmatpush1.bf16.msra.mxu0 %v4336_v32  ;;  %561 = vmatprep.mubr.f32.mxu0 %v4074_v6  ;;  %v698_v4 = vld [vmem:[#allocation4 + $0x158] sm:$0xff]  ;;  %v681_v8 = vld [vmem:[#allocation4 + $0xd0] sm:$0xff]  ;;  %v4387_v11 = vpack.c.bf16 %v694_v3, %v691_v2  ;;  %v700_v14 = vld [vmem:[#allocation4 + $0x168] sm:$0xff] }
  0x8c   : > { %3238 = vmatprep.subr.bf16.mxu0 %v4340_v36  ;;  %3260 = vmatprep.subr.bf16.mxu1 %v4075_v42  ;;  %v4390_v12 = vpack.c.bf16 %v701_v7, %v698_v4  ;;  %v697_v13 = vld [vmem:[#allocation4 + $0x150] sm:$0xff]  ;;  %v4393_v15 = vpack.c.bf16 %v684_v9, %v681_v8  ;;  %v687_v18 = vld [vmem:[#allocation4 + $0x100] sm:$0xff]  ;;  %v690_v19 = vld [vmem:[#allocation4 + $0x118] sm:$0xff] }
  0x8d   : > { %2861 = vmatprep.mubr.msk.f32.mxu1 %vm466_vm0, %v441_v33  ;;  %v4397_v20 = vpack.c.bf16 %v700_v14, %v697_v13  ;;  %v4401_v21 = vpack.c.bf16 %v690_v19, %v687_v18  ;;  %v693_v23 = vld [vmem:[#allocation4 + $0x130] sm:$0xff]  ;;  %v696_v24 = vld [vmem:[#allocation4 + $0x148] sm:$0xff]  ;;  %v699_v28 = vld [vmem:[#allocation4 + $0x160] sm:$0xff]  ;;  %v4455_v33 = vshrl.u32 %v451_v31, 7 }
  0x8e   : > { %2648 = vmatmul.mubr.msk.f32.gmra.mrb[6].mxu0 %vm466_vm0, %v442_v46  ;;  %3262 = vmatpush3.bf16.msra.mxu1 %v4356_v51  ;;  %v4405_v26 = vld [vmem:[#allocation2] sm:$0xff]  ;;  %v4408_v27 = vpack.c.bf16 %v696_v24, %v693_v23  ;;  %v702_v29 = vld [vmem:[#allocation4 + $0x178] sm:$0xff] }
  0x8f   : > { %3240 = vmatpush1.bf16.msra.mxu0 %v4348_v45  ;;  %767 = vmatprep.mubr.f32.mxu0 %v4074_v6  ;;  %v4416_v30 = vpack.c.bf16 %v702_v29, %v699_v28  ;;  %v461_v34 = vsub.s32 2, %v4455_v33  ;;  %v449_v35 = vld [vmem:[%s4851_s2] sm:$0x7]  ;;  %v453_v49 = vsub.s32 0, %v4455_v33  ;;  %v457_v50 = vsub.s32 1, %v4455_v33 }
  0x90   : > { %3242 = vmatprep.subr.bf16.mxu0 %v4353_v47  ;;  %3263 = vmatprep.subr.bf16.mxu1 %v4075_v42  ;;  %v4484_v8 = vld [vmem:[%s4853_s4] ss:$0 sm:$0xff] }
  0x91   : > { %2862 = vmatmul.mubr.msk.f32.gmra.mrb[2].mxu1 %vm466_vm0, %v442_v46  ;;  %v462_v37 = vrot.slane %v449_v35, %v461_v34  ;;  %v4473_v52 = vrot.slane %v449_v35, %v453_v49  ;;  %v4477_v54 = vrot.slane %v449_v35, %v457_v50 }
  0x92   : > { %2896 = vmatprep.mubr.msk.f32.mxu1 %vm4076_vm1, %v4074_v6  ;;  %3265 = vmatpush3.bf16.msra.mxu1 %v4370_v60 }
  0x93   : > { %3244 = vmatpush1.bf16.msra.mxu0 %v4363_v55  ;;  %3266 = vmatprep.subr.bf16.mxu1 %v4075_v42 }
  0x94   : > { %3246 = vmatprep.subr.bf16.mxu0 %v4367_v56 }
  0x96   : > { %3268 = vmatpush3.bf16.msra.mxu1 %v4383_v5 }
  0x97   : > { %3248 = vmatpush1.bf16.msra.mxu0 %v4377_v0  ;;  %3269 = vmatprep.subr.bf16.mxu1 %v4075_v42 }
  0x98   : > { %3250 = vmatprep.subr.bf16.mxu0 %v4380_v1 }
  0x9a   : > { %3271 = vmatpush3.bf16.msra.mxu1 %v4393_v15 }
  0x9b   : > { %3252 = vmatpush1.bf16.msra.mxu0 %v4387_v11  ;;  %3272 = vmatprep.subr.bf16.mxu1 %v4075_v42 }
  0x9c   : > { %3254 = vmatprep.subr.bf16.mxu0 %v4390_v12 }
  0x9e   : > { %3274 = vmatpush3.bf16.msra.mxu1 %v4401_v21 }
  0x9f   : > { %3256 = vmatpush1.bf16.msra.mxu0 %v4397_v20  ;;  %3275 = vmatprep.subr.bf16.mxu1 %v4075_v42 }
  0xa0   : > { %3282 = vmatprep.subr.bf16.mxu0 %v4310_v10 }
  0xa2   : > { %768 = vmatmul.mubr.f32.vlgmr.msra.gmra.mrb[0].mxu0 %v4405_v26  ;;  %3277 = vmatpush3.bf16.msra.mxu1 %v4408_v27 }
  0xa3   : > { %3284 = vmatpush1.bf16.msra.mxu0 %v4314_v16  ;;  %985 = vmatprep.mubr.f32.mxu0 %v4074_v6 }
  0xa4   : > { %3286 = vmatprep.subr.bf16.mxu0 %v4317_v17  ;;  %3278 = vmatprep.subr.bf16.mxu1 %v4075_v42 }
  0xa6   : > { %3280 = vmatpush3.bf16.msra.mxu1 %v4416_v30 }
  0xa7   : > { %3288 = vmatpush1.bf16.msra.mxu0 %v4321_v22  ;;  %3313 = vmatprep.subr.bf16.mxu1 %v4075_v42 }
  0xa8   : > { %3290 = vmatprep.subr.bf16.mxu0 %v4326_v25 }
  0xa9   : > { %2897 = vmatmul.mubr.f32.vlgmr.msra.gmra.mrb[4].mxu1 %v4405_v26 }
  0xaa   : > { %3315 = vmatpush3.bf16.msra.mxu1 %v4342_v39  ;;  %2931 = vmatprep.mubr.msk.f32.mxu1 %vm4076_vm1, %v4074_v6 }
  0xab   : > { %3292 = vmatpush1.bf16.msra.mxu0 %v4336_v32  ;;  %3316 = vmatprep.subr.bf16.mxu1 %v4075_v42 }
  0xac   : > { %3294 = vmatprep.subr.bf16.mxu0 %v4340_v36 }
  0xae   : > { %3318 = vmatpush3.bf16.msra.mxu1 %v4356_v51 }
  0xaf   : > { %3296 = vmatpush1.bf16.msra.mxu0 %v4348_v45  ;;  %3319 = vmatprep.subr.bf16.mxu1 %v4075_v42 }
  0xb0   : > { %3298 = vmatprep.subr.bf16.mxu0 %v4353_v47 }
  0xb2   : > { %3321 = vmatpush3.bf16.msra.mxu1 %v4370_v60 }
  0xb3   : > { %3300 = vmatpush1.bf16.msra.mxu0 %v4363_v55  ;;  %3322 = vmatprep.subr.bf16.mxu1 %v4075_v42 }
  0xb4   : > { %3302 = vmatprep.subr.bf16.mxu0 %v4367_v56 }
  0xb6   : > { %3324 = vmatpush3.bf16.msra.mxu1 %v4383_v5 }
  0xb7   : > { %3304 = vmatpush1.bf16.msra.mxu0 %v4377_v0  ;;  %3325 = vmatprep.subr.bf16.mxu1 %v4075_v42 }
  0xb8   : > { %3306 = vmatprep.subr.bf16.mxu0 %v4380_v1 }
  0xba   : > { %3327 = vmatpush3.bf16.msra.mxu1 %v4393_v15 }
  0xbb   : > { %3308 = vmatpush1.bf16.msra.mxu0 %v4387_v11  ;;  %3328 = vmatprep.subr.bf16.mxu1 %v4075_v42 }
  0xbc   : > { %3310 = vmatprep.subr.bf16.mxu0 %v4390_v12 }
  0xbe   : > { %3330 = vmatpush3.bf16.msra.mxu1 %v4401_v21 }
  0xbf   : > { %3312 = vmatpush1.bf16.msra.mxu0 %v4397_v20  ;;  %3331 = vmatprep.subr.bf16.mxu1 %v4075_v42 }
  0xc0   : > { %3338 = vmatprep.subr.bf16.mxu0 %v4310_v10 }
  0xc2   : > { %3333 = vmatpush3.bf16.msra.mxu1 %v4408_v27 }
  0xc3   : > { %3334 = vmatprep.subr.bf16.mxu1 %v4075_v42 }
  0xc6   : > { %3336 = vmatpush3.bf16.msra.mxu1 %v4416_v30 }
  0xc7   : > { %3369 = vmatprep.subr.bf16.mxu1 %v4075_v42 }
 0x15c   : > { %v2860_v38 = vpop.f32.mrb[0].mxu1 }
 0x15d   : > { %v4463_v40 = vadd.f32 %v2860_v38, %v462_v37  ;;  %v634_v41 = vpop.f32.mrb[1].mxu1 }
 0x15e   : > { %v635_v18 = vadd.f32 %v634_v41, %v462_v37 }
 0x164   : > { %v2863_v43 = vpop.f32.mrb[2].mxu1 }
 0x165   : > { %v4465_v44 = vadd.f32 %v2863_v43, %v462_v37  ;;  %v644_v46 = vpop.f32.mrb[3].mxu1 }
 0x166   : > { %v4467_v48 = vadd.f32 %v644_v46, %v462_v37 }
 0x175   : > { %v769_v53 = vpop.f32.mrb[0].mxu0 }
 0x176   : > { %v3761_v57 = vadd.f32 %v769_v53, %v4473_v52  ;;  %v771_v58 = vpop.f32.mrb[1].mxu0 }
 0x177   : > { %v3762_v61 = vadd.f32 %v771_v58, %v4477_v54 }
 0x178   : > { %v2653_v59 = vmul.f32 -1.442695, %v3761_v57 }
 0x179   : > { %v2654_v62 = vmul.f32 -1.442695, %v3762_v61 }
 0x17a   : > { %3853 = vpow2.f32 %v2653_v59 }
 0x17b   : > { %3855 = vpow2.f32 %v2654_v62 }
 0x17c   : > { %v840_v63 = vpop.f32.mrb[4].mxu1 }
 0x17d   : > { %v2898_v2 = vpop.f32.mrb[5].mxu1  ;;  %v864_v13 = vadd.f32 %v4484_v8, %v840_v63 }
 0x184   : > { %v3854_v3 = vpop.eup %3853 }
 0x185   : > { %v848_v4 = vadd.f32 1.0, %v3854_v3  ;;  %v3856_v7 = vpop.eup %3855 }
 0x186   : > { %v855_v9 = vadd.f32 1.0, %v3856_v7 }
 0x187   : > { %3857 = vrcp.f32 %v848_v4 }
 0x188   : > { %3859 = vrcp.f32 %v855_v9 }
 0x191   : > { %v3858_v14 = vpop.eup %3857 }
 0x192   : > { %v865_v19 = vmul.f32 %v3858_v14, %v864_v13  ;;  %v3860_v24 = vpop.eup %3859 }
 0x193   : > { %v868_v28 = vsub.f32 1.0, %v3860_v24  ;;  %v870_v35 = vmul.f32 %v3860_v24, %v4405_v26  ;;  %v1517_v24 = vld [vmem:[#allocation6 + $0x18] sm:$0xff] }
 0x194   : > { %v866_v23 = vadd.f32 %v865_v19, %v635_v18 }
 0x196   : > { %3861 = vtanh.f32 %v866_v23  ;;  %v1514_v23 = vld [vmem:[#allocation6] sm:$0xff] }
 0x1a0   : > { %v3862_v29 = vpop.eup %3861 }
 0x1a1   : > { %v869_v31 = vmul.f32 %v3862_v29, %v868_v28  ;;  %v1521_v29 = vld [vmem:[#allocation6 + $0x38] sm:$0xff] }
 0x1a3   : > { %v4488_v38 = vadd.f32 %v870_v35, %v869_v31  ;;  %v1524_v31 = vld [vmem:[#allocation6 + $0x50] sm:$0xff] }
 0x1a5   : > { %986 = vmatmul.mubr.f32.vlgmr.msra.gmra.mrb[2].mxu0 %v4488_v38  ;;  %2932 = vmatmul.mubr.f32.vlgmr.msra.gmra.mrb[6].mxu1 %v4488_v38 }
 0x1a6   : > { %3340 = vmatpush1.bf16.msra.mxu0 %v4314_v16  ;;  %3371 = vmatpush3.bf16.msra.mxu1 %v4342_v39 }
 0x1a7   : > { %3342 = vmatprep.subr.bf16.mxu0 %v4317_v17  ;;  %3372 = vmatprep.subr.bf16.mxu1 %v4075_v42 }
 0x1a8   : > { %1197 = vmatprep.mubr.f32.mxu0 %v4074_v6  ;;  %2966 = vmatprep.mubr.msk.f32.mxu1 %vm4076_vm1, %v4074_v6 }
 0x1aa   : > { %3344 = vmatpush1.bf16.msra.mxu0 %v4321_v22  ;;  %3374 = vmatpush3.bf16.msra.mxu1 %v4356_v51 }
 0x1ab   : > { %3346 = vmatprep.subr.bf16.mxu0 %v4326_v25  ;;  %3375 = vmatprep.subr.bf16.mxu1 %v4075_v42 }
 0x1ae   : > { %3348 = vmatpush1.bf16.msra.mxu0 %v4336_v32  ;;  %3377 = vmatpush3.bf16.msra.mxu1 %v4370_v60 }
 0x1af   : > { %3350 = vmatprep.subr.bf16.mxu0 %v4340_v36  ;;  %3378 = vmatprep.subr.bf16.mxu1 %v4075_v42 }
 0x1b2   : > { %3352 = vmatpush1.bf16.msra.mxu0 %v4348_v45  ;;  %3380 = vmatpush3.bf16.msra.mxu1 %v4383_v5 }
 0x1b3   : > { %3354 = vmatprep.subr.bf16.mxu0 %v4353_v47  ;;  %3381 = vmatprep.subr.bf16.mxu1 %v4075_v42 }
 0x1b6   : > { %3356 = vmatpush1.bf16.msra.mxu0 %v4363_v55  ;;  %3383 = vmatpush3.bf16.msra.mxu1 %v4393_v15 }
 0x1b7   : > { %3358 = vmatprep.subr.bf16.mxu0 %v4367_v56  ;;  %3384 = vmatprep.subr.bf16.mxu1 %v4075_v42 }
 0x1ba   : > { %3360 = vmatpush1.bf16.msra.mxu0 %v4377_v0  ;;  %3386 = vmatpush3.bf16.msra.mxu1 %v4401_v21 }
 0x1bb   : > { %3362 = vmatprep.subr.bf16.mxu0 %v4380_v1  ;;  %3387 = vmatprep.subr.bf16.mxu1 %v4075_v42 }
 0x1be   : > { %3364 = vmatpush1.bf16.msra.mxu0 %v4387_v11  ;;  %3389 = vmatpush3.bf16.msra.mxu1 %v4408_v27 }
 0x1bf   : > { %3366 = vmatprep.subr.bf16.mxu0 %v4390_v12  ;;  %3390 = vmatprep.subr.bf16.mxu1 %v4075_v42 }
 0x1c2   : > { %3368 = vmatpush1.bf16.msra.mxu0 %v4397_v20  ;;  %3392 = vmatpush3.bf16.msra.mxu1 %v4416_v30 }
 0x1c3   : > { %3394 = vmatprep.subr.bf16.mxu0 %v4310_v10  ;;  %3425 = vmatprep.subr.bf16.mxu1 %v4075_v42 }
 0x278   : > { %v987_v26 = vpop.f32.mrb[2].mxu0  ;;  %v1058_v37 = vpop.f32.mrb[6].mxu1 }
 0x279   : > { %v3763_v41 = vadd.f32 %v987_v26, %v4473_v52  ;;  %v989_v43 = vpop.f32.mrb[3].mxu0  ;;  %v2933_v46 = vpop.f32.mrb[7].mxu1  ;;  %v1076_v10 = vadd.f32 %v4484_v8, %v1058_v37  ;;  %v1522_v37 = vld [vmem:[#allocation6 + $0x40] sm:$0xff] }
 0x27a   : > { %v3764_v57 = vadd.f32 %v989_v43, %v4477_v54  ;;  %v3451_v43 = vpack.c.bf16 %v1517_v24, %v1514_v23  ;;  %v1554_v23 = vld [vmem:[#allocation6 + $0x140] sm:$0xff]  ;;  %v1552_v24 = vld [vmem:[#allocation6 + $0x130] sm:$0xff] }
 0x27b   : > { %v2656_v53 = vmul.f32 -1.442695, %v3763_v41  ;;  %v1525_v41 = vld [vmem:[#allocation6 + $0x58] sm:$0xff] }
 0x27c   : > { %v2657_v58 = vmul.f32 -1.442695, %v3764_v57  ;;  %v1520_v57 = vld [vmem:[#allocation6 + $0x30] sm:$0xff] }
 0x27d   : > { %3863 = vpow2.f32 %v2656_v53  ;;  %v3453_v53 = vpack.c.bf16 %v1524_v31, %v1521_v29 }
 0x27e   : > { %3865 = vpow2.f32 %v2657_v58  ;;  %v1523_v58 = vld [vmem:[#allocation6 + $0x48] sm:$0xff] }
 0x287   : > { %v3864_v59 = vpop.eup %3863 }
 0x288   : > { %v1066_v61 = vadd.f32 1.0, %v3864_v59  ;;  %v3866_v62 = vpop.eup %3865  ;;  %v3485_v59 = vpack.c.bf16 %v1525_v41, %v1522_v37  ;;  %v1553_v37 = vld [vmem:[#allocation6 + $0x138] sm:$0xff] }
 0x289   : > { %v1073_v63 = vadd.f32 1.0, %v3866_v62  ;;  %v1528_v62 = vld [vmem:[#allocation6 + $0x70] sm:$0xff]  ;;  %v1557_v41 = vld [vmem:[#allocation6 + $0x158] sm:$0xff] }
 0x28a   : > { %3867 = vrcp.f32 %v1066_v61  ;;  %v1530_v61 = vld [vmem:[#allocation6 + $0x80] sm:$0xff] }
 0x28b   : > { %3869 = vrcp.f32 %v1073_v63  ;;  %v1531_v63 = vld [vmem:[#allocation6 + $0x88] sm:$0xff] }
 0x294   : > { %v3868_v2 = vpop.eup %3867 }
 0x295   : > { %v1077_v3 = vmul.f32 %v3868_v2, %v1076_v10  ;;  %v3870_v7 = vpop.eup %3869  ;;  %v3455_v10 = vpack.c.bf16 %v1523_v58, %v1520_v57  ;;  %v1561_v57 = vld [vmem:[#allocation6 + $0x178] sm:$0xff] }
 0x296   : > { %v1080_v9 = vsub.f32 1.0, %v3870_v7  ;;  %v1082_v18 = vmul.f32 %v3870_v7, %v4488_v38  ;;  %v1529_v7 = vld [vmem:[#allocation6 + $0x78] sm:$0xff] }
 0x297   : > { %v1078_v4 = vadd.f32 %v1077_v3, %v4463_v40  ;;  %v3489_v3 = vpack.c.bf16 %v1531_v63, %v1528_v62  ;;  %v1559_v62 = vld [vmem:[#allocation6 + $0x168] sm:$0xff] }
 0x299   : > { %3871 = vtanh.f32 %v1078_v4  ;;  %v1526_v4 = vld [vmem:[#allocation6 + $0x60] sm:$0xff] }
 0x2a3   : > { %v3872_v13 = vpop.eup %3871 }
 0x2a4   : > { %v1081_v14 = vmul.f32 %v3872_v13, %v1080_v9  ;;  %v1533_v9 = vld [vmem:[#allocation6 + $0x98] sm:$0xff]  ;;  %v1536_v13 = vld [vmem:[#allocation6 + $0xb0] sm:$0xff] }
 0x2a6   : > { %v4532_v19 = vadd.f32 %v1082_v18, %v1081_v14  ;;  %v1534_v14 = vld [vmem:[#allocation6 + $0xa0] sm:$0xff]  ;;  %v1537_v18 = vld [vmem:[#allocation6 + $0xb8] sm:$0xff] }
 0x2a8   : > { %1198 = vmatmul.mubr.f32.vlgmr.msra.gmra.mrb[4].mxu0 %v4532_v19  ;;  %2967 = vmatmul.mubr.f32.vlgmr.msra.gmra.mrb[8].mxu1 %v4532_v19 }
 0x2a9   : > { %3396 = vmatpush1.bf16.msra.mxu0 %v4314_v16  ;;  %3427 = vmatpush3.bf16.msra.mxu1 %v4342_v39  ;;  %v1515_v16 = vld [vmem:[#allocation6 + $0x8] sm:$0xff] }
 0x2aa   : > { %3398 = vmatprep.subr.bf16.mxu0 %v4317_v17  ;;  %3428 = vmatprep.subr.bf16.mxu1 %v4075_v42  ;;  %v1518_v17 = vld [vmem:[#allocation6 + $0x20] sm:$0xff] }
 0x2ab   : > { %1409 = vmatprep.mubr.f32.mxu0 %v4074_v6  ;;  %3001 = vmatprep.mubr.msk.f32.mxu1 %vm4076_vm1, %v4074_v6 }
 0x2ad   : > { %3400 = vmatpush1.bf16.msra.mxu0 %v4321_v22  ;;  %3430 = vmatpush3.bf16.msra.mxu1 %v4356_v51  ;;  %v1516_v22 = vld [vmem:[#allocation6 + $0x10] sm:$0xff] }
 0x2ae   : > { %3402 = vmatprep.subr.bf16.mxu0 %v4326_v25  ;;  %3431 = vmatprep.subr.bf16.mxu1 %v4075_v42  ;;  %v3449_v25 = vpack.c.bf16 %v1518_v17, %v1515_v16  ;;  %v3459_v16 = vpack.c.bf16 %v1529_v7, %v1526_v4  ;;  %v3461_v17 = vpack.c.bf16 %v1536_v13, %v1533_v9  ;;  %v1756_v4 = vld [vmem:[#allocation8] sm:$0xff]  ;;  %v1763_v9 = vld [vmem:[#allocation8 + $0x38] sm:$0xff] }
 0x2b1   : > { %3404 = vmatpush1.bf16.msra.mxu0 %v4336_v32  ;;  %3433 = vmatpush3.bf16.msra.mxu1 %v4370_v60  ;;  %v1519_v32 = vld [vmem:[#allocation6 + $0x28] sm:$0xff] }
 0x2b2   : > { %3406 = vmatprep.subr.bf16.mxu0 %v4340_v36  ;;  %3434 = vmatprep.subr.bf16.mxu1 %v4075_v42  ;;  %v3481_v36 = vpack.c.bf16 %v1519_v32, %v1516_v22  ;;  %v3493_v22 = vpack.c.bf16 %v1537_v18, %v1534_v14  ;;  %v1535_v32 = vld [vmem:[#allocation6 + $0xa8] sm:$0xff]  ;;  %v1762_v14 = vld [vmem:[#allocation8 + $0x30] sm:$0xff] }
 0x2b3   : > { %v1765_v18 = vld [vmem:[#allocation8 + $0x48] sm:$0xff] }
 0x2b5   : > { %3408 = vmatpush1.bf16.msra.mxu0 %v4348_v45  ;;  %3436 = vmatpush3.bf16.msra.mxu1 %v4383_v5 }
 0x2b6   : > { %3410 = vmatprep.subr.bf16.mxu0 %v4353_v47  ;;  %3437 = vmatprep.subr.bf16.mxu1 %v4075_v42 }
 0x2b9   : > { %3412 = vmatpush1.bf16.msra.mxu0 %v4363_v55  ;;  %3439 = vmatpush3.bf16.msra.mxu1 %v4393_v15 }
 0x2ba   : > { %3414 = vmatprep.subr.bf16.mxu0 %v4367_v56  ;;  %3440 = vmatprep.subr.bf16.mxu1 %v4075_v42 }
 0x2bd   : > { %3416 = vmatpush1.bf16.msra.mxu0 %v4377_v0  ;;  %3442 = vmatpush3.bf16.msra.mxu1 %v4401_v21 }
 0x2be   : > { %3418 = vmatprep.subr.bf16.mxu0 %v4380_v1  ;;  %3443 = vmatprep.subr.bf16.mxu1 %v4075_v42 }
 0x2c1   : > { %3420 = vmatpush1.bf16.msra.mxu0 %v4387_v11  ;;  %3445 = vmatpush3.bf16.msra.mxu1 %v4408_v27 }
 0x2c2   : > { %3422 = vmatprep.subr.bf16.mxu0 %v4390_v12  ;;  %3446 = vmatprep.subr.bf16.mxu1 %v4075_v42 }
 0x2c5   : > { %3424 = vmatpush1.bf16.msra.mxu0 %v4397_v20  ;;  %3448 = vmatpush3.bf16.msra.mxu1 %v4416_v30 }
 0x2c6   : > { %3450 = vmatprep.subr.bf16.mxu0 %v3449_v25  ;;  %3482 = vmatprep.subr.bf16.mxu1 %v3481_v36  ;;  %v1532_v25 = vld [vmem:[#allocation6 + $0x90] sm:$0xff] }
 0x37b   : > { %v1199_v39 = vpop.f32.mrb[4].mxu0  ;;  %v1270_v45 = vpop.f32.mrb[8].mxu1 }
 0x37c   : > { %v3765_v47 = vadd.f32 %v1199_v39, %v4473_v52  ;;  %v1201_v51 = vpop.f32.mrb[5].mxu0  ;;  %v2968_v55 = vpop.f32.mrb[9].mxu1  ;;  %v1288_v15 = vadd.f32 %v4484_v8, %v1270_v45  ;;  %v1542_v39 = vld [vmem:[#allocation6 + $0xe0] sm:$0xff]  ;;  %v1540_v45 = vld [vmem:[#allocation6 + $0xd0] sm:$0xff] }
 0x37d   : > { %v3766_v60 = vadd.f32 %v1201_v51, %v4477_v54  ;;  %v3463_v51 = vpack.c.bf16 %v1535_v32, %v1532_v25  ;;  %v1768_v32 = vld [vmem:[#allocation8 + $0x60] sm:$0xff] }
 0x37e   : > { %v2658_v56 = vmul.f32 -1.442695, %v3765_v47  ;;  %v1543_v47 = vld [vmem:[#allocation6 + $0xe8] sm:$0xff] }
 0x37f   : > { %v2659_v0 = vmul.f32 -1.442695, %v3766_v60  ;;  %v1538_v60 = vld [vmem:[#allocation6 + $0xc0] sm:$0xff] }
 0x380   : > { %3873 = vpow2.f32 %v2658_v56  ;;  %v3497_v56 = vpack.c.bf16 %v1543_v47, %v1540_v45  ;;  %v1775_v45 = vld [vmem:[#allocation8 + $0x98] sm:$0xff]  ;;  %v1778_v47 = vld [vmem:[#allocation8 + $0xb0] sm:$0xff] }
 0x381   : > { %3875 = vpow2.f32 %v2659_v0  ;;  %v1541_v0 = vld [vmem:[#allocation6 + $0xd8] sm:$0xff] }
 0x38a   : > { %v3874_v1 = vpop.eup %3873 }
 0x38b   : > { %v1278_v5 = vadd.f32 1.0, %v3874_v1  ;;  %v3876_v11 = vpop.eup %3875  ;;  %v1545_v1 = vld [vmem:[#allocation6 + $0xf8] sm:$0xff] }
 0x38c   : > { %v1285_v12 = vadd.f32 1.0, %v3876_v11  ;;  %v1546_v11 = vld [vmem:[#allocation6 + $0x100] sm:$0xff] }
 0x38d   : > { %3877 = vrcp.f32 %v1278_v5  ;;  %v1548_v5 = vld [vmem:[#allocation6 + $0x110] sm:$0xff] }
 0x38e   : > { %3879 = vrcp.f32 %v1285_v12  ;;  %v1549_v12 = vld [vmem:[#allocation6 + $0x118] sm:$0xff] }
 0x397   : > { %v3878_v20 = vpop.eup %3877 }
 0x398   : > { %v1289_v21 = vmul.f32 %v3878_v20, %v1288_v15  ;;  %v3880_v30 = vpop.eup %3879  ;;  %v3467_v15 = vpack.c.bf16 %v1541_v0, %v1538_v60  ;;  %v3469_v20 = vpack.c.bf16 %v1548_v5, %v1545_v1  ;;  %v1781_v0 = vld [vmem:[#allocation8 + $0xc8] sm:$0xff]  ;;  %v1784_v1 = vld [vmem:[#allocation8 + $0xe0] sm:$0xff] }
 0x399   : > { %v1292_v40 = vsub.f32 1.0, %v3880_v30  ;;  %v1294_v26 = vmul.f32 %v3880_v30, %v4532_v19  ;;  %v1547_v30 = vld [vmem:[#allocation6 + $0x108] sm:$0xff]  ;;  %v1780_v5 = vld [vmem:[#allocation8 + $0xc0] sm:$0xff] }
 0x39a   : > { %v1290_v27 = vadd.f32 %v1289_v21, %v4467_v48  ;;  %v1527_v48 = vld [vmem:[#allocation6 + $0x68] sm:$0xff]  ;;  %v3501_v21 = vpack.c.bf16 %v1549_v12, %v1546_v11  ;;  %v4613_v11 = vpack.c.bf16 %v1784_v1, %v1781_v0  ;;  %v1783_v12 = vld [vmem:[#allocation8 + $0xd8] sm:$0xff]  ;;  %v1800_v0 = vld [vmem:[#allocation8 + $0x160] sm:$0xff] }
 0x39b   : > { %v3457_v2 = vpack.c.bf16 %v1530_v61, %v1527_v48  ;;  %v1556_v61 = vld [vmem:[#allocation6 + $0x150] sm:$0xff]  ;;  %v1803_v1 = vld [vmem:[#allocation8 + $0x178] sm:$0xff] }
 0x39c   : > { %3881 = vtanh.f32 %v1290_v27  ;;  %v1544_v27 = vld [vmem:[#allocation6 + $0xf0] sm:$0xff]  ;;  %v3479_v63 = vpack.c.bf16 %v1559_v62, %v1556_v61  ;;  %v1764_v62 = vld [vmem:[#allocation8 + $0x40] sm:$0xff] }
 0x39d   : > { %v3471_v29 = vpack.c.bf16 %v1547_v30, %v1544_v27  ;;  %v1786_v30 = vld [vmem:[#allocation8 + $0xf0] sm:$0xff] }
 0x3a6   : > { %v3882_v28 = vpop.eup %3881 }
 0x3a7   : > { %v1293_v35 = vmul.f32 %v3882_v28, %v1292_v40  ;;  %v1551_v40 = vld [vmem:[#allocation6 + $0x128] sm:$0xff] }
 0x3a8   : > { %v1555_v28 = vld [vmem:[#allocation6 + $0x148] sm:$0xff]  ;;  %v3473_v31 = vpack.c.bf16 %v1554_v23, %v1551_v40 }
 0x3a9   : > { %v4574_v46 = vadd.f32 %v1294_v26, %v1293_v35  ;;  %v3505_v35 = vpack.c.bf16 %v1555_v28, %v1552_v24  ;;  %v1550_v26 = vld [vmem:[#allocation6 + $0x120] sm:$0xff]  ;;  %v1789_v40 = vld [vmem:[#allocation8 + $0x108] sm:$0xff] }
 0x3aa   : > { %v3475_v58 = vpack.c.bf16 %v1553_v37, %v1550_v26  ;;  %v1793_v23 = vld [vmem:[#allocation8 + $0x128] sm:$0xff]  ;;  %v1796_v24 = vld [vmem:[#allocation8 + $0x140] sm:$0xff]  ;;  %v4621_v28 = vpack.c.bf16 %v1789_v40, %v1786_v30  ;;  %v1795_v37 = vld [vmem:[#allocation8 + $0x138] sm:$0xff] }
 0x3ab   : > { %1410 = vmatmul.mubr.f32.vlgmr.msra.gmra.mrb[6].mxu0 %v4574_v46  ;;  %3002 = vmatmul.mubr.f32.vlgmr.msra.gmra.mrb[10].mxu1 %v4574_v46  ;;  %v1792_v26 = vld [vmem:[#allocation8 + $0x120] sm:$0xff] }
 0x3ac   : > { %3452 = vmatpush1.bf16.msra.mxu0 %v3451_v43  ;;  %3484 = vmatpush3.bf16.msra.mxu1 %v3481_v36  ;;  %v1539_v36 = vld [vmem:[#allocation6 + $0xc8] sm:$0xff]  ;;  %v1560_v43 = vld [vmem:[#allocation6 + $0x170] sm:$0xff] }
 0x3ad   : > { %3036 = vmatprep.mubr.f32.mxu1 %v4488_v38  ;;  %3454 = vmatprep.subr.bf16.mxu0 %v3453_v53  ;;  %v3465_v55 = vpack.c.bf16 %v1542_v39, %v1539_v36  ;;  %v1558_v53 = vld [vmem:[#allocation6 + $0x160] sm:$0xff]  ;;  %v3477_v48 = vpack.c.bf16 %v1560_v43, %v1557_v41  ;;  %v1771_v36 = vld [vmem:[#allocation8 + $0x78] sm:$0xff]  ;;  %v4630_v43 = vpack.c.bf16 %v1795_v37, %v1792_v26 }
 0x3ae   : > { %3486 = vmatprep.subr.bf16.mxu1 %v3485_v59  ;;  %1643 = vmatprep.mubr.f32.mxu0 %v4074_v6  ;;  %v4603_v39 = vpack.c.bf16 %v1771_v36, %v1768_v32  ;;  %v1788_v32 = vld [vmem:[#allocation8 + $0x100] sm:$0xff]  ;;  %v1791_v36 = vld [vmem:[#allocation8 + $0x118] sm:$0xff] }
 0x3b0   : > { %3456 = vmatpush1.bf16.msra.mxu0 %v3455_v10  ;;  %3488 = vmatpush3.bf16.msra.mxu1 %v3485_v59  ;;  %v3509_v59 = vpack.c.bf16 %v1561_v57, %v1558_v53  ;;  %v1757_v10 = vld [vmem:[#allocation8 + $0x8] sm:$0xff]  ;;  %v1799_v53 = vld [vmem:[#allocation8 + $0x158] sm:$0xff]  ;;  %v1802_v57 = vld [vmem:[#allocation8 + $0x170] sm:$0xff] }
 0x3b1   : > { %3458 = vmatprep.subr.bf16.mxu0 %v3457_v2  ;;  %3490 = vmatprep.subr.bf16.mxu1 %v3489_v3  ;;  %v1760_v2 = vld [vmem:[#allocation8 + $0x20] sm:$0xff] }
 0x3b4   : > { %3460 = vmatpush1.bf16.msra.mxu0 %v3459_v16  ;;  %3492 = vmatpush3.bf16.msra.mxu1 %v3489_v3  ;;  %v4589_v3 = vpack.c.bf16 %v1760_v2, %v1757_v10  ;;  %v4597_v16 = vpack.c.bf16 %v1765_v18, %v1762_v14  ;;  %v1770_v2 = vld [vmem:[#allocation8 + $0x70] sm:$0xff] }
 0x3b5   : > { %3462 = vmatprep.subr.bf16.mxu0 %v3461_v17  ;;  %3494 = vmatprep.subr.bf16.mxu1 %v3493_v22  ;;  %v1769_v17 = vld [vmem:[#allocation8 + $0x68] sm:$0xff]  ;;  %v1782_v18 = vld [vmem:[#allocation8 + $0xd0] sm:$0xff] }
 0x3b8   : > { %3464 = vmatpush1.bf16.msra.mxu0 %v3463_v51  ;;  %3496 = vmatpush3.bf16.msra.mxu1 %v3493_v22  ;;  %v1772_v22 = vld [vmem:[#allocation8 + $0x80] sm:$0xff]  ;;  %v4607_v51 = vpack.c.bf16 %v1778_v47, %v1775_v45  ;;  %v4657_v45 = vpack.c.bf16 %v1791_v36, %v1788_v32  ;;  %v1794_v47 = vld [vmem:[#allocation8 + $0x130] sm:$0xff] }
 0x3b9   : > { %3466 = vmatprep.subr.bf16.mxu0 %v3465_v55  ;;  %3498 = vmatprep.subr.bf16.mxu1 %v3497_v56  ;;  %v4601_v25 = vpack.c.bf16 %v1772_v22, %v1769_v17  ;;  %v1774_v55 = vld [vmem:[#allocation8 + $0x90] sm:$0xff]  ;;  %v1785_v17 = vld [vmem:[#allocation8 + $0xe8] sm:$0xff] }
 0x3ba   : > { %v4653_v22 = vpack.c.bf16 %v1785_v17, %v1782_v18 }
 0x3bc   : > { %3468 = vmatpush1.bf16.msra.mxu0 %v3467_v15  ;;  %3500 = vmatpush3.bf16.msra.mxu1 %v3497_v56  ;;  %v1777_v56 = vld [vmem:[#allocation8 + $0xa8] sm:$0xff]  ;;  %v1787_v15 = vld [vmem:[#allocation8 + $0xf8] sm:$0xff] }
 0x3bd   : > { %3470 = vmatprep.subr.bf16.mxu0 %v3469_v20  ;;  %3502 = vmatprep.subr.bf16.mxu1 %v3501_v21  ;;  %v4609_v60 = vpack.c.bf16 %v1777_v56, %v1774_v55  ;;  %v1790_v20 = vld [vmem:[#allocation8 + $0x110] sm:$0xff]  ;;  %v1797_v55 = vld [vmem:[#allocation8 + $0x148] sm:$0xff] }
 0x3be   : > { %v4617_v27 = vpack.c.bf16 %v1790_v20, %v1787_v15  ;;  %v4661_v56 = vpack.c.bf16 %v1797_v55, %v1794_v47 }
 0x3c0   : > { %3472 = vmatpush1.bf16.msra.mxu0 %v3471_v29  ;;  %3504 = vmatpush3.bf16.msra.mxu1 %v3501_v21  ;;  %v4615_v21 = vpack.c.bf16 %v1783_v12, %v1780_v5  ;;  %v1758_v29 = vld [vmem:[#allocation8 + $0x10] sm:$0xff]  ;;  %v4665_v5 = vpack.c.bf16 %v1803_v1, %v1800_v0 }
 0x3c1   : > { %3474 = vmatprep.subr.bf16.mxu0 %v3473_v31  ;;  %3506 = vmatprep.subr.bf16.mxu1 %v3505_v35  ;;  %v1761_v31 = vld [vmem:[#allocation8 + $0x28] sm:$0xff] }
 0x3c2   : > { %v4626_v41 = vpack.c.bf16 %v1761_v31, %v1758_v29 }
 0x3c4   : > { %3476 = vmatpush1.bf16.msra.mxu0 %v3475_v58  ;;  %3508 = vmatpush3.bf16.msra.mxu1 %v3505_v35  ;;  %v4624_v35 = vpack.c.bf16 %v1796_v24, %v1793_v23  ;;  %v4635_v58 = vpack.c.bf16 %v1802_v57, %v1799_v53 }
 0x3c5   : > { %3478 = vmatprep.subr.bf16.mxu0 %v3477_v48  ;;  %3510 = vmatprep.subr.bf16.mxu1 %v3509_v59  ;;  %v1798_v48 = vld [vmem:[#allocation8 + $0x150] sm:$0xff] }
 0x3c8   : > { %3480 = vmatpush1.bf16.msra.mxu0 %v3479_v63  ;;  %3512 = vmatpush3.bf16.msra.mxu1 %v3509_v59  ;;  %v1801_v59 = vld [vmem:[#allocation8 + $0x168] sm:$0xff]  ;;  %v1767_v63 = vld [vmem:[#allocation8 + $0x58] sm:$0xff] }
 0x3c9   : > { %3545 = vmatprep.subr.bf16.mxu1 %v4075_v42  ;;  %3514 = vmatprep.subr.bf16.mxu0 %v4589_v3  ;;  %v4637_v61 = vpack.c.bf16 %v1801_v59, %v1798_v48  ;;  %v4640_v10 = vpack.c.bf16 %v1767_v63, %v1764_v62 }
 0x3cb   : > { %1644 = vmatmul.mubr.f32.vlgmr.msra.gmra.mrb[8].mxu0 %v4488_v38  ;;  %3037 = vmatmul.mubr.f32.vlgmr.msra.gmra.mrb[12].mxu1 %v4532_v19  ;;  %v1759_v38 = vld [vmem:[#allocation8 + $0x18] sm:$0xff] }
 0x3cc   : > { %3039 = vmatprep.mubr.f32.mxu1 %v4574_v46  ;;  %1649 = vmatprep.mubr.f32.mxu0 %v4074_v6  ;;  %v4591_v7 = vpack.c.bf16 %v1759_v38, %v1756_v4  ;;  %v1773_v4 = vld [vmem:[#allocation8 + $0x88] sm:$0xff]  ;;  %v1776_v38 = vld [vmem:[#allocation8 + $0xa0] sm:$0xff] }
 0x3cd   : > { %3547 = vmatpush3.bf16.msra.mxu1 %v4626_v41 }
 0x3ce   : > { %3516 = vmatpush1.bf16.msra.mxu0 %v4591_v7  ;;  %3548 = vmatprep.subr.bf16.mxu1 %v4075_v42 }
 0x3cf   : > { %1650 = vmatmul.mubr.f32.gmra.mrb[10].mxu0 %v4532_v19  ;;  %v1766_v19 = vld [vmem:[#allocation8 + $0x50] sm:$0xff] }
 0x3d0   : > { %1655 = vmatprep.mubr.f32.mxu0 %v4074_v6  ;;  %v4595_v13 = vpack.c.bf16 %v1766_v19, %v1763_v9  ;;  %v4646_v9 = vpack.c.bf16 %v1773_v4, %v1770_v2  ;;  %v1779_v19 = vld [vmem:[#allocation8 + $0xb8] sm:$0xff] }
 0x3d1   : > { %3550 = vmatpush3.bf16.msra.mxu1 %v4640_v10  ;;  %v4649_v14 = vpack.c.bf16 %v1779_v19, %v1776_v38 }
 0x3d2   : > { %3518 = vmatprep.subr.bf16.mxu0 %v4595_v13  ;;  %3551 = vmatprep.subr.bf16.mxu1 %v4075_v42 }
 0x3d3   : > { %1656 = vmatmul.mubr.f32.gmra.mrb[12].mxu0 %v4574_v46 }
 0x3d4   : > { %1661 = vmatprep.mubr.f32.mxu0 %v4074_v6  ;;  %3520 = vmatpush1.bf16.msra.mxu0 %v4597_v16 }
 0x3d5   : > { %3522 = vmatprep.subr.bf16.mxu0 %v4601_v25  ;;  %3553 = vmatpush3.bf16.msra.mxu1 %v4646_v9 }
 0x3d6   : > { %3554 = vmatprep.subr.bf16.mxu1 %v4075_v42 }
 0x3d8   : > { %3524 = vmatpush1.bf16.msra.mxu0 %v4603_v39 }
 0x3d9   : > { %3526 = vmatprep.subr.bf16.mxu0 %v4607_v51  ;;  %3556 = vmatpush3.bf16.msra.mxu1 %v4649_v14 }
 0x3da   : > { %3557 = vmatprep.subr.bf16.mxu1 %v4075_v42 }
 0x3dc   : > { %3528 = vmatpush1.bf16.msra.mxu0 %v4609_v60 }
 0x3dd   : > { %3530 = vmatprep.subr.bf16.mxu0 %v4613_v11  ;;  %3559 = vmatpush3.bf16.msra.mxu1 %v4653_v22 }
 0x3de   : > { %3560 = vmatprep.subr.bf16.mxu1 %v4075_v42 }
 0x3e0   : > { %3532 = vmatpush1.bf16.msra.mxu0 %v4615_v21 }
 0x3e1   : > { %3534 = vmatprep.subr.bf16.mxu0 %v4617_v27  ;;  %3562 = vmatpush3.bf16.msra.mxu1 %v4657_v45 }
 0x3e2   : > { %3563 = vmatprep.subr.bf16.mxu1 %v4075_v42 }
 0x3e4   : > { %3536 = vmatpush1.bf16.msra.mxu0 %v4621_v28 }
 0x3e5   : > { %3538 = vmatprep.subr.bf16.mxu0 %v4624_v35  ;;  %3565 = vmatpush3.bf16.msra.mxu1 %v4661_v56 }
 0x3e6   : > { %3566 = vmatprep.subr.bf16.mxu1 %v4075_v42 }
 0x3e8   : > { %3540 = vmatpush1.bf16.msra.mxu0 %v4630_v43 }
 0x3e9   : > { %3542 = vmatprep.subr.bf16.mxu0 %v4635_v58  ;;  %3568 = vmatpush3.bf16.msra.mxu1 %v4665_v5 }
 0x3ea   : > { %3601 = vmatprep.subr.bf16.mxu1 %v4075_v42 }
 0x3ec   : > { %3544 = vmatpush1.bf16.msra.mxu0 %v4637_v61 }
 0x3ed   : > { %3570 = vmatprep.subr.bf16.mxu0 %v4589_v3 }
 0x47e   : > { %v1411_v12 = vpop.f32.mrb[6].mxu0  ;;  %v1482_v15 = vpop.f32.mrb[10].mxu1 }
 0x47f   : > { %v3767_v20 = vadd.f32 %v1411_v12, %v4473_v52  ;;  %v1413_v30 = vpop.f32.mrb[7].mxu0  ;;  %v3003_v40 = vpop.f32.mrb[11].mxu1  ;;  %v1500_v57 = vadd.f32 %v4484_v8, %v1482_v15  ;;  %v4680_v8 = vld [vmem:[#allocation2 + $0x8] sm:$0xff] }
 0x480   : > { %v3768_v24 = vadd.f32 %v1413_v30, %v4477_v54 }
 0x481   : > { %v2660_v23 = vmul.f32 -1.442695, %v3767_v20 }
 0x482   : > { %v2661_v29 = vmul.f32 -1.442695, %v3768_v24 }
 0x483   : > { %3883 = vpow2.f32 %v2660_v23 }
 0x484   : > { %3885 = vpow2.f32 %v2661_v29 }
 0x48d   : > { %v3884_v31 = vpop.eup %3883 }
 0x48e   : > { %v1490_v26 = vadd.f32 1.0, %v3884_v31  ;;  %v3886_v37 = vpop.eup %3885 }
 0x48f   : > { %v1497_v53 = vadd.f32 1.0, %v3886_v37 }
 0x490   : > { %3887 = vrcp.f32 %v1490_v26 }
 0x491   : > { %3889 = vrcp.f32 %v1497_v53 }
 0x49a   : > { %v3888_v48 = vpop.eup %3887 }
 0x49b   : > { %v1501_v59 = vmul.f32 %v3888_v48, %v1500_v57  ;;  %v3890_v54 = vpop.eup %3889 }
 0x49c   : > { %v1504_v2 = vsub.f32 1.0, %v3890_v54  ;;  %v1506_v19 = vmul.f32 %v3890_v54, %v4574_v46 }
 0x49d   : > { %v1502_v52 = vadd.f32 %v1501_v59, %v4465_v44  ;;  %v1562_v44 = vld [vmem:[%s4855_s6] sm:$0x7] }
 0x49e   : > { %v4674_v62 = vpop.f32.mrb[12].mxu1  ;;  %v4730_v32 = vrot.slane %v1562_v44, %v453_v49  ;;  %v4734_v47 = vrot.slane %v1562_v44, %v457_v50  ;;  %v4741_v50 = vld [vmem:[%s4857_s8] ss:$0 sm:$0xff]  ;;  %v4745_v24 = vrot.slane %v1562_v44, %v461_v34 }
 0x49f   : > { %3891 = vtanh.f32 %v1502_v52  ;;  %v4676_v63 = vpop.f32.mrb[13].mxu1 }
 0x4a0   : > { %v1735_v37 = vadd.f32 %v4676_v63, %v4745_v24 }
 0x4a9   : > { %v3892_v4 = vpop.eup %3891 }
 0x4aa   : > { %v1505_v38 = vmul.f32 %v3892_v4, %v1504_v2 }
 0x4ac   : > { %v1507_v18 = vadd.f32 %v1506_v19, %v1505_v38 }
 0x4ae   : > { %1509 = vst [vmem:[#allocation2] sm:$0xff] %v1507_v18  ;;  %1662 = vmatmul.mubr.f32.gmra.mrb[14].mxu0 %v1507_v18  ;;  %3040 = vmatmul.mubr.f32.gmra.mrb[14].mxu1 %v1507_v18 }
 0x4af   : > { %1868 = vmatprep.mubr.f32.mxu0 %v4074_v6  ;;  %3074 = vmatprep.mubr.msk.f32.mxu1 %vm4076_vm1, %v4074_v6 }
 0x4b2   : > { %1869 = vmatmul.mubr.f32.vlgmr.msra.gmra.mrb[8].mxu0 %v4680_v8  ;;  %3075 = vmatmul.mubr.f32.vlgmr.msra.gmra.mrb[16].mxu1 %v4680_v8 }
 0x4b3   : > { %3572 = vmatpush1.bf16.msra.mxu0 %v4591_v7  ;;  %3603 = vmatpush3.bf16.msra.mxu1 %v4626_v41 }
 0x4b4   : > { %3574 = vmatprep.subr.bf16.mxu0 %v4595_v13  ;;  %3604 = vmatprep.subr.bf16.mxu1 %v4075_v42 }
 0x4b5   : > { %2037 = vmatprep.mubr.f32.mxu0 %v4074_v6  ;;  %3109 = vmatprep.mubr.msk.f32.mxu1 %vm4076_vm1, %v4074_v6 }
 0x4b7   : > { %3576 = vmatpush1.bf16.msra.mxu0 %v4597_v16  ;;  %3606 = vmatpush3.bf16.msra.mxu1 %v4640_v10 }
 0x4b8   : > { %3578 = vmatprep.subr.bf16.mxu0 %v4601_v25  ;;  %3607 = vmatprep.subr.bf16.mxu1 %v4075_v42 }
 0x4bb   : > { %3580 = vmatpush1.bf16.msra.mxu0 %v4603_v39  ;;  %3609 = vmatpush3.bf16.msra.mxu1 %v4646_v9 }
 0x4bc   : > { %3582 = vmatprep.subr.bf16.mxu0 %v4607_v51  ;;  %3610 = vmatprep.subr.bf16.mxu1 %v4075_v42 }
 0x4bf   : > { %3584 = vmatpush1.bf16.msra.mxu0 %v4609_v60  ;;  %3612 = vmatpush3.bf16.msra.mxu1 %v4649_v14 }
 0x4c0   : > { %3586 = vmatprep.subr.bf16.mxu0 %v4613_v11  ;;  %3613 = vmatprep.subr.bf16.mxu1 %v4075_v42 }
 0x4c3   : > { %3588 = vmatpush1.bf16.msra.mxu0 %v4615_v21  ;;  %3615 = vmatpush3.bf16.msra.mxu1 %v4653_v22 }
 0x4c4   : > { %3590 = vmatprep.subr.bf16.mxu0 %v4617_v27  ;;  %3616 = vmatprep.subr.bf16.mxu1 %v4075_v42 }
 0x4c7   : > { %3592 = vmatpush1.bf16.msra.mxu0 %v4621_v28  ;;  %3618 = vmatpush3.bf16.msra.mxu1 %v4657_v45 }
 0x4c8   : > { %3594 = vmatprep.subr.bf16.mxu0 %v4624_v35  ;;  %3619 = vmatprep.subr.bf16.mxu1 %v4075_v42 }
 0x4cb   : > { %3596 = vmatpush1.bf16.msra.mxu0 %v4630_v43  ;;  %3621 = vmatpush3.bf16.msra.mxu1 %v4661_v56 }
 0x4cc   : > { %3598 = vmatprep.subr.bf16.mxu0 %v4635_v58  ;;  %3622 = vmatprep.subr.bf16.mxu1 %v4075_v42 }
 0x4cf   : > { %3600 = vmatpush1.bf16.msra.mxu0 %v4637_v61  ;;  %3624 = vmatpush3.bf16.msra.mxu1 %v4665_v5 }
 0x4d0   : > { %3626 = vmatprep.subr.bf16.mxu0 %v4589_v3  ;;  %3657 = vmatprep.subr.bf16.mxu1 %v4075_v42 }
 0x581   : > { %v4724_v46 = vpop.f32.mrb[14].mxu1 }
 0x582   : > { %v4726_v17 = vpop.f32.mrb[15].mxu1 }
 0x585   : > { %v1870_v36 = vpop.f32.mrb[8].mxu0  ;;  %v1941_v55 = vpop.f32.mrb[16].mxu1 }
 0x586   : > { %v3769_v0 = vadd.f32 %v1870_v36, %v4730_v32  ;;  %v1872_v1 = vpop.f32.mrb[9].mxu0  ;;  %v3076_v12 = vpop.f32.mrb[17].mxu1  ;;  %v1965_v31 = vadd.f32 %v4741_v50, %v1941_v55 }
 0x587   : > { %v3770_v20 = vadd.f32 %v1872_v1, %v4734_v47 }
 0x588   : > { %v2662_v15 = vmul.f32 -1.442695, %v3769_v0 }
 0x589   : > { %v2663_v30 = vmul.f32 -1.442695, %v3770_v20 }
 0x58a   : > { %3893 = vpow2.f32 %v2662_v15  ;;  %v1740_v15 = vadd.f32 %v4674_v62, %v4745_v24 }
 0x58b   : > { %3895 = vpow2.f32 %v2663_v30 }
 0x594   : > { %v3894_v40 = vpop.eup %3893 }
 0x595   : > { %v1949_v23 = vadd.f32 1.0, %v3894_v40  ;;  %v3896_v49 = vpop.eup %3895 }
 0x596   : > { %v1956_v29 = vadd.f32 1.0, %v3896_v49 }
 0x597   : > { %3897 = vrcp.f32 %v1949_v23 }
 0x598   : > { %3899 = vrcp.f32 %v1956_v29 }
 0x5a1   : > { %v3898_v26 = vpop.eup %3897 }
 0x5a2   : > { %v1966_v53 = vmul.f32 %v3898_v26, %v1965_v31  ;;  %v3900_v48 = vpop.eup %3899 }
 0x5a3   : > { %v1969_v59 = vsub.f32 1.0, %v3900_v48  ;;  %v1971_v2 = vmul.f32 %v3900_v48, %v4680_v8 }
 0x5a4   : > { %v1967_v57 = vadd.f32 %v1966_v53, %v1735_v37 }
 0x5a6   : > { %3901 = vtanh.f32 %v1967_v57 }
 0x5b0   : > { %v3902_v52 = vpop.eup %3901 }
 0x5b1   : > { %v1970_v54 = vmul.f32 %v3902_v52, %v1969_v59 }
 0x5b3   : > { %v4751_v33 = vadd.f32 %v1971_v2, %v1970_v54 }
 0x5b5   : > { %2038 = vmatmul.mubr.f32.vlgmr.msra.gmra.mrb[10].mxu0 %v4751_v33  ;;  %3110 = vmatmul.mubr.f32.vlgmr.msra.gmra.mrb[18].mxu1 %v4751_v33 }
 0x5b6   : > { %3628 = vmatpush1.bf16.msra.mxu0 %v4591_v7  ;;  %3659 = vmatpush3.bf16.msra.mxu1 %v4626_v41 }
 0x5b7   : > { %3630 = vmatprep.subr.bf16.mxu0 %v4595_v13  ;;  %3660 = vmatprep.subr.bf16.mxu1 %v4075_v42 }
 0x5b8   : > { %2200 = vmatprep.mubr.f32.mxu0 %v4074_v6  ;;  %3144 = vmatprep.mubr.msk.f32.mxu1 %vm4076_vm1, %v4074_v6 }
 0x5ba   : > { %3632 = vmatpush1.bf16.msra.mxu0 %v4597_v16  ;;  %3662 = vmatpush3.bf16.msra.mxu1 %v4640_v10 }
 0x5bb   : > { %3634 = vmatprep.subr.bf16.mxu0 %v4601_v25  ;;  %3663 = vmatprep.subr.bf16.mxu1 %v4075_v42 }
 0x5be   : > { %3636 = vmatpush1.bf16.msra.mxu0 %v4603_v39  ;;  %3665 = vmatpush3.bf16.msra.mxu1 %v4646_v9 }
 0x5bf   : > { %3638 = vmatprep.subr.bf16.mxu0 %v4607_v51  ;;  %3666 = vmatprep.subr.bf16.mxu1 %v4075_v42 }
 0x5c2   : > { %3640 = vmatpush1.bf16.msra.mxu0 %v4609_v60  ;;  %3668 = vmatpush3.bf16.msra.mxu1 %v4649_v14 }
 0x5c3   : > { %3642 = vmatprep.subr.bf16.mxu0 %v4613_v11  ;;  %3669 = vmatprep.subr.bf16.mxu1 %v4075_v42 }
 0x5c6   : > { %3644 = vmatpush1.bf16.msra.mxu0 %v4615_v21  ;;  %3671 = vmatpush3.bf16.msra.mxu1 %v4653_v22 }
 0x5c7   : > { %3646 = vmatprep.subr.bf16.mxu0 %v4617_v27  ;;  %3672 = vmatprep.subr.bf16.mxu1 %v4075_v42 }
 0x5ca   : > { %3648 = vmatpush1.bf16.msra.mxu0 %v4621_v28  ;;  %3674 = vmatpush3.bf16.msra.mxu1 %v4657_v45 }
 0x5cb   : > { %3650 = vmatprep.subr.bf16.mxu0 %v4624_v35  ;;  %3675 = vmatprep.subr.bf16.mxu1 %v4075_v42 }
 0x5ce   : > { %3652 = vmatpush1.bf16.msra.mxu0 %v4630_v43  ;;  %3677 = vmatpush3.bf16.msra.mxu1 %v4661_v56 }
 0x5cf   : > { %3654 = vmatprep.subr.bf16.mxu0 %v4635_v58  ;;  %3678 = vmatprep.subr.bf16.mxu1 %v4075_v42 }
 0x5d2   : > { %3656 = vmatpush1.bf16.msra.mxu0 %v4637_v61  ;;  %3680 = vmatpush3.bf16.msra.mxu1 %v4665_v5 }
 0x5d3   : > { %3682 = vmatprep.subr.bf16.mxu0 %v4589_v3  ;;  %3713 = vmatprep.subr.bf16.mxu1 %v4075_v42 }
 0x688   : > { %v2039_v34 = vpop.f32.mrb[10].mxu0  ;;  %v2110_v63 = vpop.f32.mrb[18].mxu1 }
 0x689   : > { %v3771_v4 = vadd.f32 %v2039_v34, %v4730_v32  ;;  %v2041_v38 = vpop.f32.mrb[11].mxu0  ;;  %v3111_v19 = vpop.f32.mrb[19].mxu1  ;;  %v2128_v3 = vadd.f32 %v4741_v50, %v2110_v63  ;;  %v1750_v63 = vadd.f32 %v4724_v46, %v4745_v24 }
 0x68a   : > { %v3772_v8 = vadd.f32 %v2041_v38, %v4734_v47 }
 0x68b   : > { %v2665_v18 = vmul.f32 -1.442695, %v3771_v4 }
 0x68c   : > { %v2666_v44 = vmul.f32 -1.442695, %v3772_v8 }
 0x68d   : > { %3903 = vpow2.f32 %v2665_v18 }
 0x68e   : > { %3905 = vpow2.f32 %v2666_v44 }
 0x697   : > { %v3904_v36 = vpop.eup %3903 }
 0x698   : > { %v2118_v55 = vadd.f32 1.0, %v3904_v36  ;;  %v3906_v0 = vpop.eup %3905  ;;  %v2467_v36 = vld [vmem:[#allocation9] sm:$0xff] (!%p2671_p9) }
 0x699   : > { %v2125_v1 = vadd.f32 1.0, %v3906_v0  ;;  %v4077_v0 = vmov (!%p2671_p9), 0.0|0.0  }
 0x69a   : > { %3907 = vrcp.f32 %v2118_v55  ;;  %v2469_v55 = vld [vmem:[#allocation9 + $0x10] sm:$0xff] (!%p2671_p9) }
 0x69b   : > { %3909 = vrcp.f32 %v2125_v1  ;;  %v4079_v1 = vmov (!%p2671_p9), 0.0  }
 0x6a4   : > { %v3908_v12 = vpop.eup %3907 }
 0x6a5   : > { %v2129_v20 = vmul.f32 %v3908_v12, %v2128_v3  ;;  %v3910_v40 = vpop.eup %3909  ;;  %v2471_v12 = vld [vmem:[#allocation9 + $0x20] sm:$0xff] (!%p2671_p9) }
 0x6a6   : > { %v2132_v23 = vsub.f32 1.0, %v3910_v40  ;;  %v2134_v31 = vmul.f32 %v3910_v40, %v4751_v33  ;;  %v2474_v40 = vld [vmem:[#allocation9 + $0x38] sm:$0xff] (!%p2671_p9) }
 0x6a7   : > { %v2130_v30 = vadd.f32 %v2129_v20, %v1740_v15  ;;  %v2472_v15 = vld [vmem:[#allocation9 + $0x28] sm:$0xff] (!%p2671_p9) }
 0x6a8   : > { %v3744_v20 = vpack.c.bf16 (!%p2671_p9), %v2472_v15, %v2471_v12 }
 0x6a9   : > { %3911 = vtanh.f32 %v2130_v30  ;;  %v2473_v30 = vld [vmem:[#allocation9 + $0x30] sm:$0xff] (!%p2671_p9) }
 0x6b3   : > { %v3912_v49 = vpop.eup %3911 }
 0x6b4   : > { %v2133_v29 = vmul.f32 %v3912_v49, %v2132_v23  ;;  %v3747_v23 = vpack.c.bf16 (!%p2671_p9), %v2474_v40, %v2473_v30  ;;  %v2475_v49 = vld [vmem:[#allocation9 + $0x40] sm:$0xff] (!%p2671_p9) }
 0x6b6   : > { %v2135_v26 = vadd.f32 %v2134_v31, %v2133_v29  ;;  %v2476_v29 = vld [vmem:[#allocation9 + $0x48] sm:$0xff] (!%p2671_p9) }
 0x6b7   : > { %v3750_v31 = vpack.c.bf16 (!%p2671_p9), %v2476_v29, %v2475_v49 }
 0x6b8   : > { %2201 = vmatmul.mubr.f32.vlgmr.msra.gmra.mrb[12].mxu0 %v2135_v26  ;;  %3145 = vmatmul.mubr.f32.vlgmr.msra.gmra.mrb[20].mxu1 %v2135_v26 }
 0x6b9   : > { %3684 = vmatpush1.bf16.msra.mxu0 %v4591_v7  ;;  %3715 = vmatpush3.bf16.msra.mxu1 %v4626_v41  ;;  %v1745_v41 = vadd.f32 %v4726_v17, %v4745_v24  ;;  %v2470_v24 = vld [vmem:[#allocation9 + $0x18] sm:$0xff] (!%p2671_p9) }
 0x6ba   : > { %3686 = vmatprep.subr.bf16.mxu0 %v4595_v13  ;;  %3716 = vmatprep.subr.bf16.mxu1 %v4075_v42  ;;  %v3741_v3 = vpack.c.bf16 (!%p2671_p9), %v2470_v24, %v2469_v55 }
 0x6bb   : > { %2363 = vmatprep.mubr.f32.mxu0 %v4074_v6  ;;  %3179 = vmatprep.mubr.msk.f32.mxu1 %vm4076_vm1, %v4074_v6 }
 0x6bd   : > { %3688 = vmatpush1.bf16.msra.mxu0 %v4597_v16  ;;  %3718 = vmatpush3.bf16.msra.mxu1 %v4640_v10 }
 0x6be   : > { %3690 = vmatprep.subr.bf16.mxu0 %v4601_v25  ;;  %3719 = vmatprep.subr.bf16.mxu1 %v4075_v42 }
 0x6c1   : > { %3692 = vmatpush1.bf16.msra.mxu0 %v4603_v39  ;;  %3721 = vmatpush3.bf16.msra.mxu1 %v4646_v9 }
 0x6c2   : > { %3694 = vmatprep.subr.bf16.mxu0 %v4607_v51  ;;  %3722 = vmatprep.subr.bf16.mxu1 %v4075_v42 }
 0x6c5   : > { %3696 = vmatpush1.bf16.msra.mxu0 %v4609_v60  ;;  %3724 = vmatpush3.bf16.msra.mxu1 %v4649_v14 }
 0x6c6   : > { %3698 = vmatprep.subr.bf16.mxu0 %v4613_v11  ;;  %3725 = vmatprep.subr.bf16.mxu1 %v4075_v42 }
 0x6c9   : > { %3700 = vmatpush1.bf16.msra.mxu0 %v4615_v21  ;;  %3727 = vmatpush3.bf16.msra.mxu1 %v4653_v22 }
 0x6ca   : > { %3702 = vmatprep.subr.bf16.mxu0 %v4617_v27  ;;  %3728 = vmatprep.subr.bf16.mxu1 %v4075_v42 }
 0x6cd   : > { %3704 = vmatpush1.bf16.msra.mxu0 %v4621_v28  ;;  %3730 = vmatpush3.bf16.msra.mxu1 %v4657_v45 }
 0x6ce   : > { %3706 = vmatprep.subr.bf16.mxu0 %v4624_v35  ;;  %3731 = vmatprep.subr.bf16.mxu1 %v4075_v42 }
 0x6d1   : > { %3708 = vmatpush1.bf16.msra.mxu0 %v4630_v43  ;;  %3733 = vmatpush3.bf16.msra.mxu1 %v4661_v56 }
 0x6d2   : > { %3710 = vmatprep.subr.bf16.mxu0 %v4635_v58  ;;  %3734 = vmatprep.subr.bf16.mxu1 %v4075_v42 }
 0x6d5   : > { %3712 = vmatpush1.bf16.msra.mxu0 %v4637_v61  ;;  %3736 = vmatpush3.bf16.msra.mxu1 %v4665_v5 }
 0x6d6   : > { %3737 = vmatprep.subr.bf16.mxu0 (!%p2671_p9), %v4077_v0 }
 0x78b   : > { %v2202_v6 = vpop.f32.mrb[12].mxu0  ;;  %v2273_v7 = vpop.f32.mrb[20].mxu1 }
 0x78c   : > { %v3773_v13 = vadd.f32 %v2202_v6, %v4730_v32  ;;  %v2204_v16 = vpop.f32.mrb[13].mxu0  ;;  %v3146_v25 = vpop.f32.mrb[21].mxu1  ;;  %v2291_v28 = vadd.f32 %v4741_v50, %v2273_v7  ;;  %v2478_v6 = vld [vmem:[#allocation9 + $0x58] sm:$0xff] (!%p2671_p9) }
 0x78d   : > { %v3774_v51 = vadd.f32 %v2204_v16, %v4734_v47  ;;  %v2480_v16 = vld [vmem:[#allocation9 + $0x68] sm:$0xff] (!%p2671_p9) }
 0x78e   : > { %v2667_v39 = vmul.f32 -1.442695, %v3773_v13  ;;  %v2479_v13 = vld [vmem:[#allocation9 + $0x60] sm:$0xff] (!%p2671_p9) }
 0x78f   : > { %v2668_v60 = vmul.f32 -1.442695, %v3774_v51  ;;  %v3756_v25 = vpack.c.bf16 (!%p2671_p9), %v2480_v16, %v2479_v13  ;;  %v2482_v51 = vld [vmem:[#allocation9 + $0x78] sm:$0xff] (!%p2671_p9) }
 0x790   : > { %3913 = vpow2.f32 %v2667_v39  ;;  %v2481_v39 = vld [vmem:[#allocation9 + $0x70] sm:$0xff] (!%p2671_p9) }
 0x791   : > { %3915 = vpow2.f32 %v2668_v60  ;;  %v3759_v60 = vpack.c.bf16 (!%p2671_p9), %v2482_v51, %v2481_v39 }
 0x79a   : > { %v3914_v11 = vpop.eup %3913 }
 0x79b   : > { %v2281_v21 = vadd.f32 1.0, %v3914_v11  ;;  %v3916_v42 = vpop.eup %3915  ;;  %v2672_v11 = vld [vmem:[%s4859_s10] ss:$0 sm:$0xff] (!%p2671_p9) }
 0x79c   : > { %v2288_v27 = vadd.f32 1.0, %v3916_v42 }
 0x79d   : > { %3917 = vrcp.f32 %v2281_v21 }
 0x79e   : > { %3919 = vrcp.f32 %v2288_v27 }
 0x7a7   : > { %v3918_v35 = vpop.eup %3917 }
 0x7a8   : > { %v2292_v43 = vmul.f32 %v3918_v35, %v2291_v28  ;;  %v3920_v61 = vpop.eup %3919 }
 0x7a9   : > { %v2295_v10 = vsub.f32 1.0, %v3920_v61  ;;  %v2297_v22 = vmul.f32 %v3920_v61, %v2135_v26  ;;  %v2477_v26 = vld [vmem:[#allocation9 + $0x50] sm:$0xff] (!%p2671_p9) }
 0x7aa   : > { %v2293_v58 = vadd.f32 %v2292_v43, %v1745_v41  ;;  %v3753_v7 = vpack.c.bf16 (!%p2671_p9), %v2478_v6, %v2477_v26 }
 0x7ac   : > { %3921 = vtanh.f32 %v2293_v58 }
 0x7b6   : > { %v3922_v9 = vpop.eup %3921 }
 0x7b7   : > { %v2296_v14 = vmul.f32 %v3922_v9, %v2295_v10 }
 0x7b9   : > { %v2298_v45 = vadd.f32 %v2297_v22, %v2296_v14 }
 0x7bb   : > { %2364 = vmatmul.mubr.f32.vlgmr.msra.gmra.mrb[14].mxu0 %v2298_v45  ;;  %3180 = vmatmul.mubr.f32.vlgmr.msra.gmra.mrb[22].mxu1 %v2298_v45 }
 0x7bc   : > { %3214 = vmatprep.mubr.msk.f32.mxu0 (!%p2671_p9), %vm4078_vm2, %v4079_v1 }
 0x88e   : > { %v2365_v56 = vpop.f32.mrb[14].mxu0  ;;  %v2436_v5 = vpop.f32.mrb[22].mxu1 }
 0x88f   : > { %v3775_v62 = vadd.f32 %v2365_v56, %v4730_v32  ;;  %v2367_v37 = vpop.f32.mrb[15].mxu0  ;;  %v3181_v53 = vpop.f32.mrb[23].mxu1  ;;  %v2454_v33 = vadd.f32 %v4741_v50, %v2436_v5  ;;  %v2468_v50 = vld [vmem:[#allocation9 + $0x8] sm:$0xff] (!%p2671_p9) }
 0x890   : > { %v3776_v17 = vadd.f32 %v2367_v37, %v4734_v47  ;;  %v3738_v46 = vpack.c.bf16 (!%p2671_p9), %v2468_v50, %v2467_v36 }
 0x891   : > { %v2669_v57 = vmul.f32 -1.442695, %v3775_v62 }
 0x892   : > { %v2670_v48 = vmul.f32 -1.442695, %v3776_v17  ;;  %3739 = vmatpush3.bf16.msra.mxu0 (!%p2671_p9), %v3738_v46 }
 0x893   : > { %3923 = vpow2.f32 %v2669_v57  ;;  %3740 = vmatprep.subr.bf16.mxu0 (!%p2671_p9), %v4077_v0 }
 0x894   : > { %3925 = vpow2.f32 %v2670_v48 }
 0x896   : > { %3742 = vmatpush3.bf16.msra.mxu0 (!%p2671_p9), %v3741_v3 }
 0x897   : > { %3743 = vmatprep.subr.bf16.mxu0 (!%p2671_p9), %v4077_v0 }
 0x89a   : > { %3745 = vmatpush3.bf16.msra.mxu0 (!%p2671_p9), %v3744_v20 }
 0x89b   : > { %3746 = vmatprep.subr.bf16.mxu0 (!%p2671_p9), %v4077_v0 }
 0x89d   : > { %v3924_v59 = vpop.eup %3923 }
 0x89e   : > { %v2444_v52 = vadd.f32 1.0, %v3924_v59  ;;  %v3926_v54 = vpop.eup %3925  ;;  %3748 = vmatpush3.bf16.msra.mxu0 (!%p2671_p9), %v3747_v23 }
 0x89f   : > { %v2451_v2 = vadd.f32 1.0, %v3926_v54  ;;  %3749 = vmatprep.subr.bf16.mxu0 (!%p2671_p9), %v4077_v0 }
 0x8a0   : > { %3927 = vrcp.f32 %v2444_v52 }
 0x8a1   : > { %3929 = vrcp.f32 %v2451_v2 }
 0x8a2   : > { %3751 = vmatpush3.bf16.msra.mxu0 (!%p2671_p9), %v3750_v31 }
 0x8a3   : > { %3752 = vmatprep.subr.bf16.mxu0 (!%p2671_p9), %v4077_v0 }
 0x8a6   : > { %3754 = vmatpush3.bf16.msra.mxu0 (!%p2671_p9), %v3753_v7 }
 0x8a7   : > { %3755 = vmatprep.subr.bf16.mxu0 (!%p2671_p9), %v4077_v0 }
 0x8aa   : > { %v3928_v34 = vpop.eup %3927  ;;  %3757 = vmatpush3.bf16.msra.mxu0 (!%p2671_p9), %v3756_v25 }
 0x8ab   : > { %v2455_v32 = vmul.f32 %v3928_v34, %v2454_v33  ;;  %v3930_v38 = vpop.eup %3929  ;;  %3758 = vmatprep.subr.bf16.mxu0 (!%p2671_p9), %v4077_v0 }
 0x8ac   : > { %v2458_v47 = vsub.f32 1.0, %v3930_v38  ;;  %v2460_v8 = vmul.f32 %v3930_v38, %v2298_v45 }
 0x8ad   : > { %v2456_v4 = vadd.f32 %v2455_v32, %v1750_v63 }
 0x8ae   : > { %3760 = vmatpush3.bf16.msra.mxu0 (!%p2671_p9), %v3759_v60 }
 0x8af   : > { %3931 = vtanh.f32 %v2456_v4 }
 0x8b8   : > { %2466 = sbr.rel (%p2671_p9) target bundleno = 2453 (0x995), region = 88 }
 0x8b9   : > { %v3932_v19 = vpop.eup %3931 }
 0x8ba   : > { %v2459_v18 = vmul.f32 %v3932_v19, %v2458_v47 }
 0x8bc   : > { %v2461_v44 = vadd.f32 %v2460_v8, %v2459_v18 }
 0x8be   : > { %2462 = vst [vmem:[#allocation2 + $0x8] sm:$0xff] %v2461_v44  ;;  %3215 = vmatmul.mubr.f32.vlgmr.msra.gmra.mrb[0].mxu0 (!%p2671_p9), %v2461_v44 }
 0x991   : > { %v2556_v21 = vpop.f32.mrb[0].mxu0 }
 0x992   : > { %v2557_v42 = vadd.f32 %v2672_v11, %v2556_v21  ;;  %v3216_v27 = vpop.f32.mrb[1].mxu0 }
 0x994   : > { %2560 = vst [vmem:[%s4860_s11] sm:$0xff] %v2557_v42 }
 0x995 PF: > { %s4876_s14 = sld [smem:[#allocation14_spill]] }
 0x99b   : > { %s24_s17 = sadd.s32 1, %s4876_s14  }
 0x99c   : > { %p21_p2 = scmp.ge.s32.totalorder %s24_s17, 4  }
 0x99e   :  { %23 = sbr.rel (!%p21_p2) target bundleno = 3 (0x3), region = 116 }
 0x9a5   :  { %2572 = vsyncpa [#allocation5], 1 }
 0x9a6   :  { %2574 = vsyncpa [#allocation5 + $0x1], 1 }
 0x9a7   :  { %2575 = vsyncpa [#allocation7], 1 }
 0x9a8   :  { %2576 = vsyncpa [#allocation10], 1 }

</bundles_post_ra>
